<compile_context>
chip_gen: v5e
topology: v5e:2x2
jax: 0.10.0
libtpu: 0.0.40
codegen_flags: <defaults>
</compile_context>

<pallas_src>
import functools
from typing import NamedTuple

import jax
import jax.numpy as jnp
from jax.experimental import pallas as pl
from jax.experimental.pallas import tpu as pltpu


def _round_up(x, m):
    return ((x + m - 1) // m) * m


def _cnn_kernel(ids_ref, table_ref, wf_ref, bf_ref, o_ref, win_ref, *,
                b_blk, seq, pint, kw, kw_pad):
    # ids_ref   : SMEM (B_pad*seq,)        int32 token ids (scalar prefetch, flat)
    # table_ref : VMEM (vocab, hidden)     f32 embedding table (whole, resident)
    # wf_ref    : VMEM (pint*kw_pad, o_pad) bf16 folded conv+decoder weight
    # bf_ref    : VMEM (1, o_pad)          f32 folded bias
    # o_ref     : VMEM (b_blk, o_pad)      f32 padded output logits for this block
    # win_ref   : VMEM (b_blk, pint*kw_pad) f32 gathered, flattened conv windows
    blk = pl.program_id(0)
    vocab = table_ref.shape[0]

    # Zero the window once per step: the padding lanes (j >= kw in each slot)
    # must be 0 so the zero rows of W_fold never touch uninitialized VMEM
    # (0 * NaN = NaN).
    win_ref[...] = jnp.zeros_like(win_ref)

    # Gather: for every row of the block copy the first kw embedding columns of
    # token (b, i) into the 128-lane-aligned slot [i*kw_pad, i*kw_pad + kw).
    # b_blk and pint are tiny static ints, so a full Python unroll keeps every
    # destination offset static; only the table row index is dynamic.
    for b in range(b_blk):
        row_base = (blk * b_blk + b) * seq
        for i in range(pint):
            idx = jnp.clip(ids_ref[row_base + i], 0, vocab - 1)
            win_ref[b:b + 1, i * kw_pad:i * kw_pad + kw] = (
                table_ref[pl.ds(idx, 1), :kw])

    # Single folded matmul on the MXU: (b_blk, K_pad) @ (K_pad, o_pad), bf16
    # inputs with f32 accumulation.
    acts = win_ref[...].astype(wf_ref.dtype)
    o_ref[...] = (jnp.dot(acts, wf_ref[...], preferred_element_type=jnp.float32)
                  + bf_ref[...]).astype(o_ref.dtype)


class PreparedCNN(NamedTuple):
    table: jax.Array   # (vocab, hidden) f32, VMEM-resident inside the kernel
    wf: jax.Array      # (pint*kw_pad, o_pad) bf16 folded conv+decoder weight
    bf: jax.Array      # (1, o_pad) f32 folded bias
    pint: int
    kw: int
    kw_pad: int
    hidden: int
    out_size: int
    vocab: int


def prepare_params(table, w_conv, b_conv, w_dec, b_dec,
                   *, weight_dtype=jnp.bfloat16):
    """One-time layout plumbing + algebraic fold (run once, reuse per call)."""
    vocab, hidden = table.shape
    out_ch, in_ch, pint, kw = w_conv.shape            # (hidden, 1, pint, 4*pint)
    out_size, dec_in = w_dec.shape
    assert in_ch == 1 and out_ch == hidden and dec_in == hidden
    assert hidden >= kw, "conv kernel width must fit inside hidden"
    # Whole-table VMEM residency (char-level vocab => tiny).
    assert vocab * hidden * 4 <= 4 * (1 << 20), (
        "embedding table too large for the VMEM-resident path; use an HBM "
        "gather variant for big vocabularies")

    kw_pad = _round_up(kw, 128)
    o_pad = _round_up(out_size, 128)

    # Conv weight (hidden, 1, pint, kw) -> (pint*kw, hidden); row-major flatten
    # over (i, j) matches the flattened embedding window win[i*kw + j] = E[i, j].
    wc = jnp.transpose(w_conv[:, 0].reshape(hidden, pint * kw)).astype(jnp.float32)
    wd_t = w_dec.T.astype(jnp.float32)                               # (hidden, out)

    # Exact fold (no nonlinearity between conv and decoder Linear).
    w_fold = wc @ wd_t                                               # (pint*kw, out)
    b_fold = b_conv.astype(jnp.float32) @ wd_t + b_dec.astype(jnp.float32)

    # Scatter folded-weight rows into 128-lane-aligned slots:
    # row i*kw_pad + j  <-  w_fold[i*kw + j];  padding rows/cols are zero.
    wf = jnp.pad(w_fold.reshape(pint, kw, out_size),
                 ((0, 0), (0, kw_pad - kw), (0, o_pad - out_size)))
    wf = wf.reshape(pint * kw_pad, o_pad).astype(weight_dtype)
    bf = jnp.pad(b_fold.reshape(1, out_size),
                 ((0, 0), (0, o_pad - out_size))).astype(jnp.float32)

    return PreparedCNN(table=table.astype(jnp.float32), wf=wf, bf=bf,
                       pint=int(pint), kw=int(kw), kw_pad=int(kw_pad),
                       hidden=int(hidden), out_size=int(out_size),
                       vocab=int(vocab))


def cnn_forward(p: PreparedCNN, token_ids, *, block_b=8):
    """Forward pass.  Accepts (seq,) (PyTorch semantics, returns (1, out)) or a
    (B, seq) batch (equivalent to B independent forward calls)."""
    squeeze = token_ids.ndim == 1
    ids = token_ids[None, :] if squeeze else token_ids
    B, seq = ids.shape

    # The decoder Linear(hidden, out) requires a 1x1 spatial conv output.
    h_out = (seq - p.pint) // 4 + 1
    w_out = (p.hidden - p.kw) // 4 + 1
    assert seq >= p.pint and p.hidden >= p.kw
    assert h_out == 1 and w_out == 1, "decoder Linear needs a 1x1 conv output"
    assert block_b % 8 == 0, "batch block must be sublane-aligned"

    b_blk = block_b
    B_pad = _round_up(B, b_blk)
    nb = B_pad // b_blk
    K_pad = p.wf.shape[0]
    o_pad = p.wf.shape[1]

    ids_flat = jnp.pad(ids.astype(jnp.int32),
                       ((0, B_pad - B), (0, 0))).reshape(-1)

    kernel = functools.partial(_cnn_kernel, b_blk=b_blk, seq=seq,
                               pint=p.pint, kw=p.kw, kw_pad=p.kw_pad)

    vocab, hidden = p.table.shape
    flops = 2 * B_pad * K_pad * o_pad
    bytes_accessed = (p.table.size * 4
                      + p.wf.size * p.wf.dtype.itemsize
                      + p.bf.size * 4
                      + ids_flat.size * 4
                      + B_pad * o_pad * 4)

    out = pl.pallas_call(
        kernel,
        out_shape=jax.ShapeDtypeStruct((B_pad, o_pad), jnp.float32),
        grid_spec=pltpu.PrefetchScalarGridSpec(
            num_scalar_prefetch=1,                   # token ids -> SMEM
            grid=(nb,),
            in_specs=[
                # Whole-array VMEM residency (constant block index => fetched
                # once, never re-DMA'd across batch blocks).
                pl.BlockSpec((vocab, hidden), lambda g, ids: (0, 0)),   # table
                pl.BlockSpec((K_pad, o_pad), lambda g, ids: (0, 0)),    # W_fold
                pl.BlockSpec((1, o_pad), lambda g, ids: (0, 0)),        # b_fold
            ],
            out_specs=pl.BlockSpec((b_blk, o_pad), lambda g, ids: (g, 0)),
            scratch_shapes=[
                pltpu.VMEM((b_blk, K_pad), jnp.float32),   # gathered windows
            ],
        ),
        compiler_params=pltpu.CompilerParams(
            dimension_semantics=("parallel",)),            # both TCs on v7x
        cost_estimate=pl.CostEstimate(flops=flops, transcendentals=0,
                                      bytes_accessed=bytes_accessed),
    )(ids_flat, p.table, p.wf, p.bf)

    out = out[:B, :p.out_size]                             # drop pad rows/lanes
    return out if not squeeze else out[0:1]


if __name__ == "__main__":
    # Small shapes consistent with the module: Linear(hidden, out) after the
    # conv forces hidden == 4*pint (within +3) and seq == pint (within +3).
    input_size, hidden_size, pint, output_size = 16, 32, 8, 10
    seq_len = pint
    batch = 8

    key = jax.random.PRNGKey(0)
    k_tab, k_wc, k_bc, k_wd, k_bd, k_in = jax.random.split(key, 6)
    table = jax.random.normal(k_tab, (input_size, hidden_size), jnp.float32)
    w_conv = 0.05 * jax.random.normal(k_wc, (hidden_size, 1, pint, 4 * pint),
                                      jnp.float32)
    b_conv = 0.05 * jax.random.normal(k_bc, (hidden_size,), jnp.float32)
    w_dec = 0.10 * jax.random.normal(k_wd, (output_size, hidden_size), jnp.float32)
    b_dec = 0.10 * jax.random.normal(k_bd, (output_size,), jnp.float32)
    token_ids = jax.random.randint(k_in, (batch, seq_len), 0, input_size,
                                   dtype=jnp.int32)

    prepared = prepare_params(table, w_conv, b_conv, w_dec, b_dec)
    out = jax.block_until_ready(cnn_forward(prepared, token_ids))

    # Pure-JAX f32 reference of the exact PyTorch semantics (per sequence).
    emb = table[token_ids]                                     # (B, seq, hidden)
    win = emb[:, :pint, :4 * pint].reshape(batch, -1)          # (B, pint*kw)
    conv = win @ w_conv[:, 0].reshape(hidden_size, -1).T + b_conv
    ref = conv @ w_dec.T + b_dec                               # (B, out)

    # Tolerance covers the bf16 folded-weight / activation rounding.
    assert out.shape == (batch, output_size)
    assert jnp.allclose(out, ref, atol=2e-2, rtol=2e-2), (out, ref)

    # Single-sequence path matches the PyTorch (1, out) output convention.
    single = jax.block_until_ready(cnn_forward(prepared, token_ids[0]))
    assert single.shape == (1, output_size)
    assert jnp.allclose(single, ref[0:1], atol=2e-2, rtol=2e-2), (single, ref[0])

    print("KERNEL_OK")
</pallas_src>

<mosaic_0001>
module attributes {stable_mosaic.version = 11 : i64} {
  func.func @_cnn_kernel(%arg0: i32, %arg1: memref<64xi32, #tpu.memory_space<smem>>, %arg2: memref<16x32xf32, #tpu.memory_space<vmem>>, %arg3: memref<1024x128xbf16, #tpu.memory_space<vmem>>, %arg4: memref<1x128xf32, #tpu.memory_space<vmem>>, %arg5: memref<8x128xf32, #tpu.memory_space<vmem>>, %arg6: memref<8x1024xf32, #tpu.memory_space<vmem>>) attributes {dimension_semantics = [#tpu.dimension_semantics<parallel>], iteration_bounds = array<i64: 1>, scalar_prefetch = 1 : i64, scratch_operands = 1 : i64, tpu.core_type = #tpu.core_type<tc>, window_params = [{pipeline_mode = #tpu.pipeline_mode<synchronous>, transform_indices = @transform_0, window_bounds = array<i64: 16, 32>}, {pipeline_mode = #tpu.pipeline_mode<synchronous>, transform_indices = @transform_1, window_bounds = array<i64: 1024, 128>}, {pipeline_mode = #tpu.pipeline_mode<synchronous>, transform_indices = @transform_2, window_bounds = array<i64: 1, 128>}, {transform_indices = @transform_3, window_bounds = array<i64: 8, 128>}]} {
    %cst = arith.constant 0.000000e+00 : f32
    %0 = vector.broadcast %cst : f32 to vector<8x1024xf32>
    %c0 = arith.constant 0 : index
    %c0_0 = arith.constant 0 : index
    %1 = vector.load %arg6[%c0, %c0_0] : memref<8x1024xf32, #tpu.memory_space<vmem>>, vector<8x1024xf32>
    tpu.vector_store %arg6[%c0, %c0_0], %0 {strides = array<i32>} : memref<8x1024xf32, #tpu.memory_space<vmem>>, vector<8x1024xf32>,
    %c8_i32 = arith.constant 8 : i32
    %2 = arith.muli %arg0, %c8_i32 : i32
    %c0_i32 = arith.constant 0 : i32
    %3 = arith.addi %2, %c0_i32 : i32
    %c8_i32_1 = arith.constant 8 : i32
    %4 = arith.muli %3, %c8_i32_1 : i32
    %c0_i32_2 = arith.constant 0 : i32
    %5 = arith.addi %4, %c0_i32_2 : i32
    %6 = arith.index_cast %5 : i32 to index
    %7 = memref.load %arg1[%6] : memref<64xi32, #tpu.memory_space<smem>>
    %c0_i32_3 = arith.constant 0 : i32
    %c15_i32 = arith.constant 15 : i32
    %8 = arith.maxsi %c0_i32_3, %7 : i32
    %9 = arith.minsi %c15_i32, %8 : i32
    %10 = arith.index_cast %9 : i32 to index
    %c0_4 = arith.constant 0 : index
    %11 = vector.load %arg2[%10, %c0_4] : memref<16x32xf32, #tpu.memory_space<vmem>>, vector<1x32xf32>
    %c0_5 = arith.constant 0 : index
    %c0_6 = arith.constant 0 : index
    %12 = vector.load %arg6[%c0_5, %c0_6] : memref<8x1024xf32, #tpu.memory_space<vmem>>, vector<1x32xf32>
    tpu.vector_store %arg6[%c0_5, %c0_6], %11 {strides = array<i32>} : memref<8x1024xf32, #tpu.memory_space<vmem>>, vector<1x32xf32>,
    %c1_i32 = arith.constant 1 : i32
    %13 = arith.addi %4, %c1_i32 : i32
    %14 = arith.index_cast %13 : i32 to index
    %15 = memref.load %arg1[%14] : memref<64xi32, #tpu.memory_space<smem>>
    %c0_i32_7 = arith.constant 0 : i32
    %c15_i32_8 = arith.constant 15 : i32
    %16 = arith.maxsi %c0_i32_7, %15 : i32
    %17 = arith.minsi %c15_i32_8, %16 : i32
    %18 = arith.index_cast %17 : i32 to index
    %c0_9 = arith.constant 0 : index
    %19 = vector.load %arg2[%18, %c0_9] : memref<16x32xf32, #tpu.memory_space<vmem>>, vector<1x32xf32>
    %c0_10 = arith.constant 0 : index
    %c128 = arith.constant 128 : index
    %20 = vector.load %arg6[%c0_10, %c128] : memref<8x1024xf32, #tpu.memory_space<vmem>>, vector<1x32xf32>
    tpu.vector_store %arg6[%c0_10, %c128], %19 {strides = array<i32>} : memref<8x1024xf32, #tpu.memory_space<vmem>>, vector<1x32xf32>,
    %c2_i32 = arith.constant 2 : i32
    %21 = arith.addi %4, %c2_i32 : i32
    %22 = arith.index_cast %21 : i32 to index
    %23 = memref.load %arg1[%22] : memref<64xi32, #tpu.memory_space<smem>>
    %c0_i32_11 = arith.constant 0 : i32
    %c15_i32_12 = arith.constant 15 : i32
    %24 = arith.maxsi %c0_i32_11, %23 : i32
    %25 = arith.minsi %c15_i32_12, %24 : i32
    %26 = arith.index_cast %25 : i32 to index
    %c0_13 = arith.constant 0 : index
    %27 = vector.load %arg2[%26, %c0_13] : memref<16x32xf32, #tpu.memory_space<vmem>>, vector<1x32xf32>
    %c0_14 = arith.constant 0 : index
    %c256 = arith.constant 256 : index
    %28 = vector.load %arg6[%c0_14, %c256] : memref<8x1024xf32, #tpu.memory_space<vmem>>, vector<1x32xf32>
    tpu.vector_store %arg6[%c0_14, %c256], %27 {strides = array<i32>} : memref<8x1024xf32, #tpu.memory_space<vmem>>, vector<1x32xf32>,
    %c3_i32 = arith.constant 3 : i32
    %29 = arith.addi %4, %c3_i32 : i32
    %30 = arith.index_cast %29 : i32 to index
    %31 = memref.load %arg1[%30] : memref<64xi32, #tpu.memory_space<smem>>
    %c0_i32_15 = arith.constant 0 : i32
    %c15_i32_16 = arith.constant 15 : i32
    %32 = arith.maxsi %c0_i32_15, %31 : i32
    %33 = arith.minsi %c15_i32_16, %32 : i32
    %34 = arith.index_cast %33 : i32 to index
    %c0_17 = arith.constant 0 : index
    %35 = vector.load %arg2[%34, %c0_17] : memref<16x32xf32, #tpu.memory_space<vmem>>, vector<1x32xf32>
    %c0_18 = arith.constant 0 : index
    %c384 = arith.constant 384 : index
    %36 = vector.load %arg6[%c0_18, %c384] : memref<8x1024xf32, #tpu.memory_space<vmem>>, vector<1x32xf32>
    tpu.vector_store %arg6[%c0_18, %c384], %35 {strides = array<i32>} : memref<8x1024xf32, #tpu.memory_space<vmem>>, vector<1x32xf32>,
    %c4_i32 = arith.constant 4 : i32
    %37 = arith.addi %4, %c4_i32 : i32
    %38 = arith.index_cast %37 : i32 to index
    %39 = memref.load %arg1[%38] : memref<64xi32, #tpu.memory_space<smem>>
    %c0_i32_19 = arith.constant 0 : i32
    %c15_i32_20 = arith.constant 15 : i32
    %40 = arith.maxsi %c0_i32_19, %39 : i32
    %41 = arith.minsi %c15_i32_20, %40 : i32
    %42 = arith.index_cast %41 : i32 to index
    %c0_21 = arith.constant 0 : index
    %43 = vector.load %arg2[%42, %c0_21] : memref<16x32xf32, #tpu.memory_space<vmem>>, vector<1x32xf32>
    %c0_22 = arith.constant 0 : index
    %c512 = arith.constant 512 : index
    %44 = vector.load %arg6[%c0_22, %c512] : memref<8x1024xf32, #tpu.memory_space<vmem>>, vector<1x32xf32>
    tpu.vector_store %arg6[%c0_22, %c512], %43 {strides = array<i32>} : memref<8x1024xf32, #tpu.memory_space<vmem>>, vector<1x32xf32>,
    %c5_i32 = arith.constant 5 : i32
    %45 = arith.addi %4, %c5_i32 : i32
    %46 = arith.index_cast %45 : i32 to index
    %47 = memref.load %arg1[%46] : memref<64xi32, #tpu.memory_space<smem>>
    %c0_i32_23 = arith.constant 0 : i32
    %c15_i32_24 = arith.constant 15 : i32
    %48 = arith.maxsi %c0_i32_23, %47 : i32
    %49 = arith.minsi %c15_i32_24, %48 : i32
    %50 = arith.index_cast %49 : i32 to index
    %c0_25 = arith.constant 0 : index
    %51 = vector.load %arg2[%50, %c0_25] : memref<16x32xf32, #tpu.memory_space<vmem>>, vector<1x32xf32>
    %c0_26 = arith.constant 0 : index
    %c640 = arith.constant 640 : index
    %52 = vector.load %arg6[%c0_26, %c640] : memref<8x1024xf32, #tpu.memory_space<vmem>>, vector<1x32xf32>
    tpu.vector_store %arg6[%c0_26, %c640], %51 {strides = array<i32>} : memref<8x1024xf32, #tpu.memory_space<vmem>>, vector<1x32xf32>,
    %c6_i32 = arith.constant 6 : i32
    %53 = arith.addi %4, %c6_i32 : i32
    %54 = arith.index_cast %53 : i32 to index
    %55 = memref.load %arg1[%54] : memref<64xi32, #tpu.memory_space<smem>>
    %c0_i32_27 = arith.constant 0 : i32
    %c15_i32_28 = arith.constant 15 : i32
    %56 = arith.maxsi %c0_i32_27, %55 : i32
    %57 = arith.minsi %c15_i32_28, %56 : i32
    %58 = arith.index_cast %57 : i32 to index
    %c0_29 = arith.constant 0 : index
    %59 = vector.load %arg2[%58, %c0_29] : memref<16x32xf32, #tpu.memory_space<vmem>>, vector<1x32xf32>
    %c0_30 = arith.constant 0 : index
    %c768 = arith.constant 768 : index
    %60 = vector.load %arg6[%c0_30, %c768] : memref<8x1024xf32, #tpu.memory_space<vmem>>, vector<1x32xf32>
    tpu.vector_store %arg6[%c0_30, %c768], %59 {strides = array<i32>} : memref<8x1024xf32, #tpu.memory_space<vmem>>, vector<1x32xf32>,
    %c7_i32 = arith.constant 7 : i32
    %61 = arith.addi %4, %c7_i32 : i32
    %62 = arith.index_cast %61 : i32 to index
    %63 = memref.load %arg1[%62] : memref<64xi32, #tpu.memory_space<smem>>
    %c0_i32_31 = arith.constant 0 : i32
    %c15_i32_32 = arith.constant 15 : i32
    %64 = arith.maxsi %c0_i32_31, %63 : i32
    %65 = arith.minsi %c15_i32_32, %64 : i32
    %66 = arith.index_cast %65 : i32 to index
    %c0_33 = arith.constant 0 : index
    %67 = vector.load %arg2[%66, %c0_33] : memref<16x32xf32, #tpu.memory_space<vmem>>, vector<1x32xf32>
    %c0_34 = arith.constant 0 : index
    %c896 = arith.constant 896 : index
    %68 = vector.load %arg6[%c0_34, %c896] : memref<8x1024xf32, #tpu.memory_space<vmem>>, vector<1x32xf32>
    tpu.vector_store %arg6[%c0_34, %c896], %67 {strides = array<i32>} : memref<8x1024xf32, #tpu.memory_space<vmem>>, vector<1x32xf32>,
    %c8_i32_35 = arith.constant 8 : i32
    %69 = arith.muli %arg0, %c8_i32_35 : i32
    %c1_i32_36 = arith.constant 1 : i32
    %70 = arith.addi %69, %c1_i32_36 : i32
    %c8_i32_37 = arith.constant 8 : i32
    %71 = arith.muli %70, %c8_i32_37 : i32
    %c0_i32_38 = arith.constant 0 : i32
    %72 = arith.addi %71, %c0_i32_38 : i32
    %73 = arith.index_cast %72 : i32 to index
    %74 = memref.load %arg1[%73] : memref<64xi32, #tpu.memory_space<smem>>
    %c0_i32_39 = arith.constant 0 : i32
    %c15_i32_40 = arith.constant 15 : i32
    %75 = arith.maxsi %c0_i32_39, %74 : i32
    %76 = arith.minsi %c15_i32_40, %75 : i32
    %77 = arith.index_cast %76 : i32 to index
    %c0_41 = arith.constant 0 : index
    %78 = vector.load %arg2[%77, %c0_41] : memref<16x32xf32, #tpu.memory_space<vmem>>, vector<1x32xf32>
    %c1 = arith.constant 1 : index
    %c0_42 = arith.constant 0 : index
    %79 = vector.load %arg6[%c1, %c0_42] : memref<8x1024xf32, #tpu.memory_space<vmem>>, vector<1x32xf32>
    tpu.vector_store %arg6[%c1, %c0_42], %78 {strides = array<i32>} : memref<8x1024xf32, #tpu.memory_space<vmem>>, vector<1x32xf32>,
    %c1_i32_43 = arith.constant 1 : i32
    %80 = arith.addi %71, %c1_i32_43 : i32
    %81 = arith.index_cast %80 : i32 to index
    %82 = memref.load %arg1[%81] : memref<64xi32, #tpu.memory_space<smem>>
    %c0_i32_44 = arith.constant 0 : i32
    %c15_i32_45 = arith.constant 15 : i32
    %83 = arith.maxsi %c0_i32_44, %82 : i32
    %84 = arith.minsi %c15_i32_45, %83 : i32
    %85 = arith.index_cast %84 : i32 to index
    %c0_46 = arith.constant 0 : index
    %86 = vector.load %arg2[%85, %c0_46] : memref<16x32xf32, #tpu.memory_space<vmem>>, vector<1x32xf32>
    %c1_47 = arith.constant 1 : index
    %c128_48 = arith.constant 128 : index
    %87 = vector.load %arg6[%c1_47, %c128_48] : memref<8x1024xf32, #tpu.memory_space<vmem>>, vector<1x32xf32>
    tpu.vector_store %arg6[%c1_47, %c128_48], %86 {strides = array<i32>} : memref<8x1024xf32, #tpu.memory_space<vmem>>, vector<1x32xf32>,
    %c2_i32_49 = arith.constant 2 : i32
    %88 = arith.addi %71, %c2_i32_49 : i32
    %89 = arith.index_cast %88 : i32 to index
    %90 = memref.load %arg1[%89] : memref<64xi32, #tpu.memory_space<smem>>
    %c0_i32_50 = arith.constant 0 : i32
    %c15_i32_51 = arith.constant 15 : i32
    %91 = arith.maxsi %c0_i32_50, %90 : i32
    %92 = arith.minsi %c15_i32_51, %91 : i32
    %93 = arith.index_cast %92 : i32 to index
    %c0_52 = arith.constant 0 : index
    %94 = vector.load %arg2[%93, %c0_52] : memref<16x32xf32, #tpu.memory_space<vmem>>, vector<1x32xf32>
    %c1_53 = arith.constant 1 : index
    %c256_54 = arith.constant 256 : index
    %95 = vector.load %arg6[%c1_53, %c256_54] : memref<8x1024xf32, #tpu.memory_space<vmem>>, vector<1x32xf32>
    tpu.vector_store %arg6[%c1_53, %c256_54], %94 {strides = array<i32>} : memref<8x1024xf32, #tpu.memory_space<vmem>>, vector<1x32xf32>,
    %c3_i32_55 = arith.constant 3 : i32
    %96 = arith.addi %71, %c3_i32_55 : i32
    %97 = arith.index_cast %96 : i32 to index
    %98 = memref.load %arg1[%97] : memref<64xi32, #tpu.memory_space<smem>>
    %c0_i32_56 = arith.constant 0 : i32
    %c15_i32_57 = arith.constant 15 : i32
    %99 = arith.maxsi %c0_i32_56, %98 : i32
    %100 = arith.minsi %c15_i32_57, %99 : i32
    %101 = arith.index_cast %100 : i32 to index
    %c0_58 = arith.constant 0 : index
    %102 = vector.load %arg2[%101, %c0_58] : memref<16x32xf32, #tpu.memory_space<vmem>>, vector<1x32xf32>
    %c1_59 = arith.constant 1 : index
    %c384_60 = arith.constant 384 : index
    %103 = vector.load %arg6[%c1_59, %c384_60] : memref<8x1024xf32, #tpu.memory_space<vmem>>, vector<1x32xf32>
    tpu.vector_store %arg6[%c1_59, %c384_60], %102 {strides = array<i32>} : memref<8x1024xf32, #tpu.memory_space<vmem>>, vector<1x32xf32>,
    %c4_i32_61 = arith.constant 4 : i32
    %104 = arith.addi %71, %c4_i32_61 : i32
    %105 = arith.index_cast %104 : i32 to index
    %106 = memref.load %arg1[%105] : memref<64xi32, #tpu.memory_space<smem>>
    %c0_i32_62 = arith.constant 0 : i32
    %c15_i32_63 = arith.constant 15 : i32
    %107 = arith.maxsi %c0_i32_62, %106 : i32
    %108 = arith.minsi %c15_i32_63, %107 : i32
    %109 = arith.index_cast %108 : i32 to index
    %c0_64 = arith.constant 0 : index
    %110 = vector.load %arg2[%109, %c0_64] : memref<16x32xf32, #tpu.memory_space<vmem>>, vector<1x32xf32>
    %c1_65 = arith.constant 1 : index
    %c512_66 = arith.constant 512 : index
    %111 = vector.load %arg6[%c1_65, %c512_66] : memref<8x1024xf32, #tpu.memory_space<vmem>>, vector<1x32xf32>
    tpu.vector_store %arg6[%c1_65, %c512_66], %110 {strides = array<i32>} : memref<8x1024xf32, #tpu.memory_space<vmem>>, vector<1x32xf32>,
    %c5_i32_67 = arith.constant 5 : i32
    %112 = arith.addi %71, %c5_i32_67 : i32
    %113 = arith.index_cast %112 : i32 to index
    %114 = memref.load %arg1[%113] : memref<64xi32, #tpu.memory_space<smem>>
    %c0_i32_68 = arith.constant 0 : i32
    %c15_i32_69 = arith.constant 15 : i32
    %115 = arith.maxsi %c0_i32_68, %114 : i32
    %116 = arith.minsi %c15_i32_69, %115 : i32
    %117 = arith.index_cast %116 : i32 to index
    %c0_70 = arith.constant 0 : index
    %118 = vector.load %arg2[%117, %c0_70] : memref<16x32xf32, #tpu.memory_space<vmem>>, vector<1x32xf32>
    %c1_71 = arith.constant 1 : index
    %c640_72 = arith.constant 640 : index
    %119 = vector.load %arg6[%c1_71, %c640_72] : memref<8x1024xf32, #tpu.memory_space<vmem>>, vector<1x32xf32>
    tpu.vector_store %arg6[%c1_71, %c640_72], %118 {strides = array<i32>} : memref<8x1024xf32, #tpu.memory_space<vmem>>, vector<1x32xf32>,
    %c6_i32_73 = arith.constant 6 : i32
    %120 = arith.addi %71, %c6_i32_73 : i32
    %121 = arith.index_cast %120 : i32 to index
    %122 = memref.load %arg1[%121] : memref<64xi32, #tpu.memory_space<smem>>
    %c0_i32_74 = arith.constant 0 : i32
    %c15_i32_75 = arith.constant 15 : i32
    %123 = arith.maxsi %c0_i32_74, %122 : i32
    %124 = arith.minsi %c15_i32_75, %123 : i32
    %125 = arith.index_cast %124 : i32 to index
    %c0_76 = arith.constant 0 : index
    %126 = vector.load %arg2[%125, %c0_76] : memref<16x32xf32, #tpu.memory_space<vmem>>, vector<1x32xf32>
    %c1_77 = arith.constant 1 : index
    %c768_78 = arith.constant 768 : index
    %127 = vector.load %arg6[%c1_77, %c768_78] : memref<8x1024xf32, #tpu.memory_space<vmem>>, vector<1x32xf32>
    tpu.vector_store %arg6[%c1_77, %c768_78], %126 {strides = array<i32>} : memref<8x1024xf32, #tpu.memory_space<vmem>>, vector<1x32xf32>,
    %c7_i32_79 = arith.constant 7 : i32
    %128 = arith.addi %71, %c7_i32_79 : i32
    %129 = arith.index_cast %128 : i32 to index
    %130 = memref.load %arg1[%129] : memref<64xi32, #tpu.memory_space<smem>>
    %c0_i32_80 = arith.constant 0 : i32
    %c15_i32_81 = arith.constant 15 : i32
    %131 = arith.maxsi %c0_i32_80, %130 : i32
    %132 = arith.minsi %c15_i32_81, %131 : i32
    %133 = arith.index_cast %132 : i32 to index
    %c0_82 = arith.constant 0 : index
    %134 = vector.load %arg2[%133, %c0_82] : memref<16x32xf32, #tpu.memory_space<vmem>>, vector<1x32xf32>
    %c1_83 = arith.constant 1 : index
    %c896_84 = arith.constant 896 : index
    %135 = vector.load %arg6[%c1_83, %c896_84] : memref<8x1024xf32, #tpu.memory_space<vmem>>, vector<1x32xf32>
    tpu.vector_store %arg6[%c1_83, %c896_84], %134 {strides = array<i32>} : memref<8x1024xf32, #tpu.memory_space<vmem>>, vector<1x32xf32>,
    %c8_i32_85 = arith.constant 8 : i32
    %136 = arith.muli %arg0, %c8_i32_85 : i32
    %c2_i32_86 = arith.constant 2 : i32
    %137 = arith.addi %136, %c2_i32_86 : i32
    %c8_i32_87 = arith.constant 8 : i32
    %138 = arith.muli %137, %c8_i32_87 : i32
    %c0_i32_88 = arith.constant 0 : i32
    %139 = arith.addi %138, %c0_i32_88 : i32
    %140 = arith.index_cast %139 : i32 to index
    %141 = memref.load %arg1[%140] : memref<64xi32, #tpu.memory_space<smem>>
    %c0_i32_89 = arith.constant 0 : i32
    %c15_i32_90 = arith.constant 15 : i32
    %142 = arith.maxsi %c0_i32_89, %141 : i32
    %143 = arith.minsi %c15_i32_90, %142 : i32
    %144 = arith.index_cast %143 : i32 to index
    %c0_91 = arith.constant 0 : index
    %145 = vector.load %arg2[%144, %c0_91] : memref<16x32xf32, #tpu.memory_space<vmem>>, vector<1x32xf32>
    %c2 = arith.constant 2 : index
    %c0_92 = arith.constant 0 : index
    %146 = vector.load %arg6[%c2, %c0_92] : memref<8x1024xf32, #tpu.memory_space<vmem>>, vector<1x32xf32>
    tpu.vector_store %arg6[%c2, %c0_92], %145 {strides = array<i32>} : memref<8x1024xf32, #tpu.memory_space<vmem>>, vector<1x32xf32>,
    %c1_i32_93 = arith.constant 1 : i32
    %147 = arith.addi %138, %c1_i32_93 : i32
    %148 = arith.index_cast %147 : i32 to index
    %149 = memref.load %arg1[%148] : memref<64xi32, #tpu.memory_space<smem>>
    %c0_i32_94 = arith.constant 0 : i32
    %c15_i32_95 = arith.constant 15 : i32
    %150 = arith.maxsi %c0_i32_94, %149 : i32
    %151 = arith.minsi %c15_i32_95, %150 : i32
    %152 = arith.index_cast %151 : i32 to index
    %c0_96 = arith.constant 0 : index
    %153 = vector.load %arg2[%152, %c0_96] : memref<16x32xf32, #tpu.memory_space<vmem>>, vector<1x32xf32>
    %c2_97 = arith.constant 2 : index
    %c128_98 = arith.constant 128 : index
    %154 = vector.load %arg6[%c2_97, %c128_98] : memref<8x1024xf32, #tpu.memory_space<vmem>>, vector<1x32xf32>
    tpu.vector_store %arg6[%c2_97, %c128_98], %153 {strides = array<i32>} : memref<8x1024xf32, #tpu.memory_space<vmem>>, vector<1x32xf32>,
    %c2_i32_99 = arith.constant 2 : i32
    %155 = arith.addi %138, %c2_i32_99 : i32
    %156 = arith.index_cast %155 : i32 to index
    %157 = memref.load %arg1[%156] : memref<64xi32, #tpu.memory_space<smem>>
    %c0_i32_100 = arith.constant 0 : i32
    %c15_i32_101 = arith.constant 15 : i32
    %158 = arith.maxsi %c0_i32_100, %157 : i32
    %159 = arith.minsi %c15_i32_101, %158 : i32
    %160 = arith.index_cast %159 : i32 to index
    %c0_102 = arith.constant 0 : index
    %161 = vector.load %arg2[%160, %c0_102] : memref<16x32xf32, #tpu.memory_space<vmem>>, vector<1x32xf32>
    %c2_103 = arith.constant 2 : index
    %c256_104 = arith.constant 256 : index
    %162 = vector.load %arg6[%c2_103, %c256_104] : memref<8x1024xf32, #tpu.memory_space<vmem>>, vector<1x32xf32>
    tpu.vector_store %arg6[%c2_103, %c256_104], %161 {strides = array<i32>} : memref<8x1024xf32, #tpu.memory_space<vmem>>, vector<1x32xf32>,
    %c3_i32_105 = arith.constant 3 : i32
    %163 = arith.addi %138, %c3_i32_105 : i32
    %164 = arith.index_cast %163 : i32 to index
    %165 = memref.load %arg1[%164] : memref<64xi32, #tpu.memory_space<smem>>
    %c0_i32_106 = arith.constant 0 : i32
    %c15_i32_107 = arith.constant 15 : i32
    %166 = arith.maxsi %c0_i32_106, %165 : i32
    %167 = arith.minsi %c15_i32_107, %166 : i32
    %168 = arith.index_cast %167 : i32 to index
    %c0_108 = arith.constant 0 : index
    %169 = vector.load %arg2[%168, %c0_108] : memref<16x32xf32, #tpu.memory_space<vmem>>, vector<1x32xf32>
    %c2_109 = arith.constant 2 : index
    %c384_110 = arith.constant 384 : index
    %170 = vector.load %arg6[%c2_109, %c384_110] : memref<8x1024xf32, #tpu.memory_space<vmem>>, vector<1x32xf32>
    tpu.vector_store %arg6[%c2_109, %c384_110], %169 {strides = array<i32>} : memref<8x1024xf32, #tpu.memory_space<vmem>>, vector<1x32xf32>,
    %c4_i32_111 = arith.constant 4 : i32
    %171 = arith.addi %138, %c4_i32_111 : i32
    %172 = arith.index_cast %171 : i32 to index
    %173 = memref.load %arg1[%172] : memref<64xi32, #tpu.memory_space<smem>>
    %c0_i32_112 = arith.constant 0 : i32
    %c15_i32_113 = arith.constant 15 : i32
    %174 = arith.maxsi %c0_i32_112, %173 : i32
    %175 = arith.minsi %c15_i32_113, %174 : i32
    %176 = arith.index_cast %175 : i32 to index
    %c0_114 = arith.constant 0 : index
    %177 = vector.load %arg2[%176, %c0_114] : memref<16x32xf32, #tpu.memory_space<vmem>>, vector<1x32xf32>
    %c2_115 = arith.constant 2 : index
    %c512_116 = arith.constant 512 : index
    %178 = vector.load %arg6[%c2_115, %c512_116] : memref<8x1024xf32, #tpu.memory_space<vmem>>, vector<1x32xf32>
    tpu.vector_store %arg6[%c2_115, %c512_116], %177 {strides = array<i32>} : memref<8x1024xf32, #tpu.memory_space<vmem>>, vector<1x32xf32>,
    %c5_i32_117 = arith.constant 5 : i32
    %179 = arith.addi %138, %c5_i32_117 : i32
    %180 = arith.index_cast %179 : i32 to index
    %181 = memref.load %arg1[%180] : memref<64xi32, #tpu.memory_space<smem>>
    %c0_i32_118 = arith.constant 0 : i32
    %c15_i32_119 = arith.constant 15 : i32
    %182 = arith.maxsi %c0_i32_118, %181 : i32
    %183 = arith.minsi %c15_i32_119, %182 : i32
    %184 = arith.index_cast %183 : i32 to index
    %c0_120 = arith.constant 0 : index
    %185 = vector.load %arg2[%184, %c0_120] : memref<16x32xf32, #tpu.memory_space<vmem>>, vector<1x32xf32>
    %c2_121 = arith.constant 2 : index
    %c640_122 = arith.constant 640 : index
    %186 = vector.load %arg6[%c2_121, %c640_122] : memref<8x1024xf32, #tpu.memory_space<vmem>>, vector<1x32xf32>
    tpu.vector_store %arg6[%c2_121, %c640_122], %185 {strides = array<i32>} : memref<8x1024xf32, #tpu.memory_space<vmem>>, vector<1x32xf32>,
    %c6_i32_123 = arith.constant 6 : i32
    %187 = arith.addi %138, %c6_i32_123 : i32
    %188 = arith.index_cast %187 : i32 to index
    %189 = memref.load %arg1[%188] : memref<64xi32, #tpu.memory_space<smem>>
    %c0_i32_124 = arith.constant 0 : i32
    %c15_i32_125 = arith.constant 15 : i32
    %190 = arith.maxsi %c0_i32_124, %189 : i32
    %191 = arith.minsi %c15_i32_125, %190 : i32
    %192 = arith.index_cast %191 : i32 to index
    %c0_126 = arith.constant 0 : index
    %193 = vector.load %arg2[%192, %c0_126] : memref<16x32xf32, #tpu.memory_space<vmem>>, vector<1x32xf32>
    %c2_127 = arith.constant 2 : index
    %c768_128 = arith.constant 768 : index
    %194 = vector.load %arg6[%c2_127, %c768_128] : memref<8x1024xf32, #tpu.memory_space<vmem>>, vector<1x32xf32>
    tpu.vector_store %arg6[%c2_127, %c768_128], %193 {strides = array<i32>} : memref<8x1024xf32, #tpu.memory_space<vmem>>, vector<1x32xf32>,
    %c7_i32_129 = arith.constant 7 : i32
    %195 = arith.addi %138, %c7_i32_129 : i32
    %196 = arith.index_cast %195 : i32 to index
    %197 = memref.load %arg1[%196] : memref<64xi32, #tpu.memory_space<smem>>
    %c0_i32_130 = arith.constant 0 : i32
    %c15_i32_131 = arith.constant 15 : i32
    %198 = arith.maxsi %c0_i32_130, %197 : i32
    %199 = arith.minsi %c15_i32_131, %198 : i32
    %200 = arith.index_cast %199 : i32 to index
    %c0_132 = arith.constant 0 : index
    %201 = vector.load %arg2[%200, %c0_132] : memref<16x32xf32, #tpu.memory_space<vmem>>, vector<1x32xf32>
    %c2_133 = arith.constant 2 : index
    %c896_134 = arith.constant 896 : index
    %202 = vector.load %arg6[%c2_133, %c896_134] : memref<8x1024xf32, #tpu.memory_space<vmem>>, vector<1x32xf32>
    tpu.vector_store %arg6[%c2_133, %c896_134], %201 {strides = array<i32>} : memref<8x1024xf32, #tpu.memory_space<vmem>>, vector<1x32xf32>,
    %c8_i32_135 = arith.constant 8 : i32
    %203 = arith.muli %arg0, %c8_i32_135 : i32
    %c3_i32_136 = arith.constant 3 : i32
    %204 = arith.addi %203, %c3_i32_136 : i32
    %c8_i32_137 = arith.constant 8 : i32
    %205 = arith.muli %204, %c8_i32_137 : i32
    %c0_i32_138 = arith.constant 0 : i32
    %206 = arith.addi %205, %c0_i32_138 : i32
    %207 = arith.index_cast %206 : i32 to index
    %208 = memref.load %arg1[%207] : memref<64xi32, #tpu.memory_space<smem>>
    %c0_i32_139 = arith.constant 0 : i32
    %c15_i32_140 = arith.constant 15 : i32
    %209 = arith.maxsi %c0_i32_139, %208 : i32
    %210 = arith.minsi %c15_i32_140, %209 : i32
    %211 = arith.index_cast %210 : i32 to index
    %c0_141 = arith.constant 0 : index
    %212 = vector.load %arg2[%211, %c0_141] : memref<16x32xf32, #tpu.memory_space<vmem>>, vector<1x32xf32>
    %c3 = arith.constant 3 : index
    %c0_142 = arith.constant 0 : index
    %213 = vector.load %arg6[%c3, %c0_142] : memref<8x1024xf32, #tpu.memory_space<vmem>>, vector<1x32xf32>
    tpu.vector_store %arg6[%c3, %c0_142], %212 {strides = array<i32>} : memref<8x1024xf32, #tpu.memory_space<vmem>>, vector<1x32xf32>,
    %c1_i32_143 = arith.constant 1 : i32
    %214 = arith.addi %205, %c1_i32_143 : i32
    %215 = arith.index_cast %214 : i32 to index
    %216 = memref.load %arg1[%215] : memref<64xi32, #tpu.memory_space<smem>>
    %c0_i32_144 = arith.constant 0 : i32
    %c15_i32_145 = arith.constant 15 : i32
    %217 = arith.maxsi %c0_i32_144, %216 : i32
    %218 = arith.minsi %c15_i32_145, %217 : i32
    %219 = arith.index_cast %218 : i32 to index
    %c0_146 = arith.constant 0 : index
    %220 = vector.load %arg2[%219, %c0_146] : memref<16x32xf32, #tpu.memory_space<vmem>>, vector<1x32xf32>
    %c3_147 = arith.constant 3 : index
    %c128_148 = arith.constant 128 : index
    %221 = vector.load %arg6[%c3_147, %c128_148] : memref<8x1024xf32, #tpu.memory_space<vmem>>, vector<1x32xf32>
    tpu.vector_store %arg6[%c3_147, %c128_148], %220 {strides = array<i32>} : memref<8x1024xf32, #tpu.memory_space<vmem>>, vector<1x32xf32>,
    %c2_i32_149 = arith.constant 2 : i32
    %222 = arith.addi %205, %c2_i32_149 : i32
    %223 = arith.index_cast %222 : i32 to index
    %224 = memref.load %arg1[%223] : memref<64xi32, #tpu.memory_space<smem>>
    %c0_i32_150 = arith.constant 0 : i32
    %c15_i32_151 = arith.constant 15 : i32
    %225 = arith.maxsi %c0_i32_150, %224 : i32
    %226 = arith.minsi %c15_i32_151, %225 : i32
    %227 = arith.index_cast %226 : i32 to index
    %c0_152 = arith.constant 0 : index
    %228 = vector.load %arg2[%227, %c0_152] : memref<16x32xf32, #tpu.memory_space<vmem>>, vector<1x32xf32>
    %c3_153 = arith.constant 3 : index
    %c256_154 = arith.constant 256 : index
    %229 = vector.load %arg6[%c3_153, %c256_154] : memref<8x1024xf32, #tpu.memory_space<vmem>>, vector<1x32xf32>
    tpu.vector_store %arg6[%c3_153, %c256_154], %228 {strides = array<i32>} : memref<8x1024xf32, #tpu.memory_space<vmem>>, vector<1x32xf32>,
    %c3_i32_155 = arith.constant 3 : i32
    %230 = arith.addi %205, %c3_i32_155 : i32
    %231 = arith.index_cast %230 : i32 to index
    %232 = memref.load %arg1[%231] : memref<64xi32, #tpu.memory_space<smem>>
    %c0_i32_156 = arith.constant 0 : i32
    %c15_i32_157 = arith.constant 15 : i32
    %233 = arith.maxsi %c0_i32_156, %232 : i32
    %234 = arith.minsi %c15_i32_157, %233 : i32
    %235 = arith.index_cast %234 : i32 to index
    %c0_158 = arith.constant 0 : index
    %236 = vector.load %arg2[%235, %c0_158] : memref<16x32xf32, #tpu.memory_space<vmem>>, vector<1x32xf32>
    %c3_159 = arith.constant 3 : index
    %c384_160 = arith.constant 384 : index
    %237 = vector.load %arg6[%c3_159, %c384_160] : memref<8x1024xf32, #tpu.memory_space<vmem>>, vector<1x32xf32>
    tpu.vector_store %arg6[%c3_159, %c384_160], %236 {strides = array<i32>} : memref<8x1024xf32, #tpu.memory_space<vmem>>, vector<1x32xf32>,
    %c4_i32_161 = arith.constant 4 : i32
    %238 = arith.addi %205, %c4_i32_161 : i32
    %239 = arith.index_cast %238 : i32 to index
    %240 = memref.load %arg1[%239] : memref<64xi32, #tpu.memory_space<smem>>
    %c0_i32_162 = arith.constant 0 : i32
    %c15_i32_163 = arith.constant 15 : i32
    %241 = arith.maxsi %c0_i32_162, %240 : i32
    %242 = arith.minsi %c15_i32_163, %241 : i32
    %243 = arith.index_cast %242 : i32 to index
    %c0_164 = arith.constant 0 : index
    %244 = vector.load %arg2[%243, %c0_164] : memref<16x32xf32, #tpu.memory_space<vmem>>, vector<1x32xf32>
    %c3_165 = arith.constant 3 : index
    %c512_166 = arith.constant 512 : index
    %245 = vector.load %arg6[%c3_165, %c512_166] : memref<8x1024xf32, #tpu.memory_space<vmem>>, vector<1x32xf32>
    tpu.vector_store %arg6[%c3_165, %c512_166], %244 {strides = array<i32>} : memref<8x1024xf32, #tpu.memory_space<vmem>>, vector<1x32xf32>,
    %c5_i32_167 = arith.constant 5 : i32
    %246 = arith.addi %205, %c5_i32_167 : i32
    %247 = arith.index_cast %246 : i32 to index
    %248 = memref.load %arg1[%247] : memref<64xi32, #tpu.memory_space<smem>>
    %c0_i32_168 = arith.constant 0 : i32
    %c15_i32_169 = arith.constant 15 : i32
    %249 = arith.maxsi %c0_i32_168, %248 : i32
    %250 = arith.minsi %c15_i32_169, %249 : i32
    %251 = arith.index_cast %250 : i32 to index
    %c0_170 = arith.constant 0 : index
    %252 = vector.load %arg2[%251, %c0_170] : memref<16x32xf32, #tpu.memory_space<vmem>>, vector<1x32xf32>
    %c3_171 = arith.constant 3 : index
    %c640_172 = arith.constant 640 : index
    %253 = vector.load %arg6[%c3_171, %c640_172] : memref<8x1024xf32, #tpu.memory_space<vmem>>, vector<1x32xf32>
    tpu.vector_store %arg6[%c3_171, %c640_172], %252 {strides = array<i32>} : memref<8x1024xf32, #tpu.memory_space<vmem>>, vector<1x32xf32>,
    %c6_i32_173 = arith.constant 6 : i32
    %254 = arith.addi %205, %c6_i32_173 : i32
    %255 = arith.index_cast %254 : i32 to index
    %256 = memref.load %arg1[%255] : memref<64xi32, #tpu.memory_space<smem>>
    %c0_i32_174 = arith.constant 0 : i32
    %c15_i32_175 = arith.constant 15 : i32
    %257 = arith.maxsi %c0_i32_174, %256 : i32
    %258 = arith.minsi %c15_i32_175, %257 : i32
    %259 = arith.index_cast %258 : i32 to index
    %c0_176 = arith.constant 0 : index
    %260 = vector.load %arg2[%259, %c0_176] : memref<16x32xf32, #tpu.memory_space<vmem>>, vector<1x32xf32>
    %c3_177 = arith.constant 3 : index
    %c768_178 = arith.constant 768 : index
    %261 = vector.load %arg6[%c3_177, %c768_178] : memref<8x1024xf32, #tpu.memory_space<vmem>>, vector<1x32xf32>
    tpu.vector_store %arg6[%c3_177, %c768_178], %260 {strides = array<i32>} : memref<8x1024xf32, #tpu.memory_space<vmem>>, vector<1x32xf32>,
    %c7_i32_179 = arith.constant 7 : i32
    %262 = arith.addi %205, %c7_i32_179 : i32
    %263 = arith.index_cast %262 : i32 to index
    %264 = memref.load %arg1[%263] : memref<64xi32, #tpu.memory_space<smem>>
    %c0_i32_180 = arith.constant 0 : i32
    %c15_i32_181 = arith.constant 15 : i32
    %265 = arith.maxsi %c0_i32_180, %264 : i32
    %266 = arith.minsi %c15_i32_181, %265 : i32
    %267 = arith.index_cast %266 : i32 to index
    %c0_182 = arith.constant 0 : index
    %268 = vector.load %arg2[%267, %c0_182] : memref<16x32xf32, #tpu.memory_space<vmem>>, vector<1x32xf32>
    %c3_183 = arith.constant 3 : index
    %c896_184 = arith.constant 896 : index
    %269 = vector.load %arg6[%c3_183, %c896_184] : memref<8x1024xf32, #tpu.memory_space<vmem>>, vector<1x32xf32>
    tpu.vector_store %arg6[%c3_183, %c896_184], %268 {strides = array<i32>} : memref<8x1024xf32, #tpu.memory_space<vmem>>, vector<1x32xf32>,
    %c8_i32_185 = arith.constant 8 : i32
    %270 = arith.muli %arg0, %c8_i32_185 : i32
    %c4_i32_186 = arith.constant 4 : i32
    %271 = arith.addi %270, %c4_i32_186 : i32
    %c8_i32_187 = arith.constant 8 : i32
    %272 = arith.muli %271, %c8_i32_187 : i32
    %c0_i32_188 = arith.constant 0 : i32
    %273 = arith.addi %272, %c0_i32_188 : i32
    %274 = arith.index_cast %273 : i32 to index
    %275 = memref.load %arg1[%274] : memref<64xi32, #tpu.memory_space<smem>>
    %c0_i32_189 = arith.constant 0 : i32
    %c15_i32_190 = arith.constant 15 : i32
    %276 = arith.maxsi %c0_i32_189, %275 : i32
    %277 = arith.minsi %c15_i32_190, %276 : i32
    %278 = arith.index_cast %277 : i32 to index
    %c0_191 = arith.constant 0 : index
    %279 = vector.load %arg2[%278, %c0_191] : memref<16x32xf32, #tpu.memory_space<vmem>>, vector<1x32xf32>
    %c4 = arith.constant 4 : index
    %c0_192 = arith.constant 0 : index
    %280 = vector.load %arg6[%c4, %c0_192] : memref<8x1024xf32, #tpu.memory_space<vmem>>, vector<1x32xf32>
    tpu.vector_store %arg6[%c4, %c0_192], %279 {strides = array<i32>} : memref<8x1024xf32, #tpu.memory_space<vmem>>, vector<1x32xf32>,
    %c1_i32_193 = arith.constant 1 : i32
    %281 = arith.addi %272, %c1_i32_193 : i32
    %282 = arith.index_cast %281 : i32 to index
    %283 = memref.load %arg1[%282] : memref<64xi32, #tpu.memory_space<smem>>
    %c0_i32_194 = arith.constant 0 : i32
    %c15_i32_195 = arith.constant 15 : i32
    %284 = arith.maxsi %c0_i32_194, %283 : i32
    %285 = arith.minsi %c15_i32_195, %284 : i32
    %286 = arith.index_cast %285 : i32 to index
    %c0_196 = arith.constant 0 : index
    %287 = vector.load %arg2[%286, %c0_196] : memref<16x32xf32, #tpu.memory_space<vmem>>, vector<1x32xf32>
    %c4_197 = arith.constant 4 : index
    %c128_198 = arith.constant 128 : index
    %288 = vector.load %arg6[%c4_197, %c128_198] : memref<8x1024xf32, #tpu.memory_space<vmem>>, vector<1x32xf32>
    tpu.vector_store %arg6[%c4_197, %c128_198], %287 {strides = array<i32>} : memref<8x1024xf32, #tpu.memory_space<vmem>>, vector<1x32xf32>,
    %c2_i32_199 = arith.constant 2 : i32
    %289 = arith.addi %272, %c2_i32_199 : i32
    %290 = arith.index_cast %289 : i32 to index
    %291 = memref.load %arg1[%290] : memref<64xi32, #tpu.memory_space<smem>>
    %c0_i32_200 = arith.constant 0 : i32
    %c15_i32_201 = arith.constant 15 : i32
    %292 = arith.maxsi %c0_i32_200, %291 : i32
    %293 = arith.minsi %c15_i32_201, %292 : i32
    %294 = arith.index_cast %293 : i32 to index
    %c0_202 = arith.constant 0 : index
    %295 = vector.load %arg2[%294, %c0_202] : memref<16x32xf32, #tpu.memory_space<vmem>>, vector<1x32xf32>
    %c4_203 = arith.constant 4 : index
    %c256_204 = arith.constant 256 : index
    %296 = vector.load %arg6[%c4_203, %c256_204] : memref<8x1024xf32, #tpu.memory_space<vmem>>, vector<1x32xf32>
    tpu.vector_store %arg6[%c4_203, %c256_204], %295 {strides = array<i32>} : memref<8x1024xf32, #tpu.memory_space<vmem>>, vector<1x32xf32>,
    %c3_i32_205 = arith.constant 3 : i32
    %297 = arith.addi %272, %c3_i32_205 : i32
    %298 = arith.index_cast %297 : i32 to index
    %299 = memref.load %arg1[%298] : memref<64xi32, #tpu.memory_space<smem>>
    %c0_i32_206 = arith.constant 0 : i32
    %c15_i32_207 = arith.constant 15 : i32
    %300 = arith.maxsi %c0_i32_206, %299 : i32
    %301 = arith.minsi %c15_i32_207, %300 : i32
    %302 = arith.index_cast %301 : i32 to index
    %c0_208 = arith.constant 0 : index
    %303 = vector.load %arg2[%302, %c0_208] : memref<16x32xf32, #tpu.memory_space<vmem>>, vector<1x32xf32>
    %c4_209 = arith.constant 4 : index
    %c384_210 = arith.constant 384 : index
    %304 = vector.load %arg6[%c4_209, %c384_210] : memref<8x1024xf32, #tpu.memory_space<vmem>>, vector<1x32xf32>
    tpu.vector_store %arg6[%c4_209, %c384_210], %303 {strides = array<i32>} : memref<8x1024xf32, #tpu.memory_space<vmem>>, vector<1x32xf32>,
    %c4_i32_211 = arith.constant 4 : i32
    %305 = arith.addi %272, %c4_i32_211 : i32
    %306 = arith.index_cast %305 : i32 to index
    %307 = memref.load %arg1[%306] : memref<64xi32, #tpu.memory_space<smem>>
    %c0_i32_212 = arith.constant 0 : i32
    %c15_i32_213 = arith.constant 15 : i32
    %308 = arith.maxsi %c0_i32_212, %307 : i32
    %309 = arith.minsi %c15_i32_213, %308 : i32
    %310 = arith.index_cast %309 : i32 to index
    %c0_214 = arith.constant 0 : index
    %311 = vector.load %arg2[%310, %c0_214] : memref<16x32xf32, #tpu.memory_space<vmem>>, vector<1x32xf32>
    %c4_215 = arith.constant 4 : index
    %c512_216 = arith.constant 512 : index
    %312 = vector.load %arg6[%c4_215, %c512_216] : memref<8x1024xf32, #tpu.memory_space<vmem>>, vector<1x32xf32>
    tpu.vector_store %arg6[%c4_215, %c512_216], %311 {strides = array<i32>} : memref<8x1024xf32, #tpu.memory_space<vmem>>, vector<1x32xf32>,
    %c5_i32_217 = arith.constant 5 : i32
    %313 = arith.addi %272, %c5_i32_217 : i32
    %314 = arith.index_cast %313 : i32 to index
    %315 = memref.load %arg1[%314] : memref<64xi32, #tpu.memory_space<smem>>
    %c0_i32_218 = arith.constant 0 : i32
    %c15_i32_219 = arith.constant 15 : i32
    %316 = arith.maxsi %c0_i32_218, %315 : i32
    %317 = arith.minsi %c15_i32_219, %316 : i32
    %318 = arith.index_cast %317 : i32 to index
    %c0_220 = arith.constant 0 : index
    %319 = vector.load %arg2[%318, %c0_220] : memref<16x32xf32, #tpu.memory_space<vmem>>, vector<1x32xf32>
    %c4_221 = arith.constant 4 : index
    %c640_222 = arith.constant 640 : index
    %320 = vector.load %arg6[%c4_221, %c640_222] : memref<8x1024xf32, #tpu.memory_space<vmem>>, vector<1x32xf32>
    tpu.vector_store %arg6[%c4_221, %c640_222], %319 {strides = array<i32>} : memref<8x1024xf32, #tpu.memory_space<vmem>>, vector<1x32xf32>,
    %c6_i32_223 = arith.constant 6 : i32
    %321 = arith.addi %272, %c6_i32_223 : i32
    %322 = arith.index_cast %321 : i32 to index
    %323 = memref.load %arg1[%322] : memref<64xi32, #tpu.memory_space<smem>>
    %c0_i32_224 = arith.constant 0 : i32
    %c15_i32_225 = arith.constant 15 : i32
    %324 = arith.maxsi %c0_i32_224, %323 : i32
    %325 = arith.minsi %c15_i32_225, %324 : i32
    %326 = arith.index_cast %325 : i32 to index
    %c0_226 = arith.constant 0 : index
    %327 = vector.load %arg2[%326, %c0_226] : memref<16x32xf32, #tpu.memory_space<vmem>>, vector<1x32xf32>
    %c4_227 = arith.constant 4 : index
    %c768_228 = arith.constant 768 : index
    %328 = vector.load %arg6[%c4_227, %c768_228] : memref<8x1024xf32, #tpu.memory_space<vmem>>, vector<1x32xf32>
    tpu.vector_store %arg6[%c4_227, %c768_228], %327 {strides = array<i32>} : memref<8x1024xf32, #tpu.memory_space<vmem>>, vector<1x32xf32>,
    %c7_i32_229 = arith.constant 7 : i32
    %329 = arith.addi %272, %c7_i32_229 : i32
    %330 = arith.index_cast %329 : i32 to index
    %331 = memref.load %arg1[%330] : memref<64xi32, #tpu.memory_space<smem>>
    %c0_i32_230 = arith.constant 0 : i32
    %c15_i32_231 = arith.constant 15 : i32
    %332 = arith.maxsi %c0_i32_230, %331 : i32
    %333 = arith.minsi %c15_i32_231, %332 : i32
    %334 = arith.index_cast %333 : i32 to index
    %c0_232 = arith.constant 0 : index
    %335 = vector.load %arg2[%334, %c0_232] : memref<16x32xf32, #tpu.memory_space<vmem>>, vector<1x32xf32>
    %c4_233 = arith.constant 4 : index
    %c896_234 = arith.constant 896 : index
    %336 = vector.load %arg6[%c4_233, %c896_234] : memref<8x1024xf32, #tpu.memory_space<vmem>>, vector<1x32xf32>
    tpu.vector_store %arg6[%c4_233, %c896_234], %335 {strides = array<i32>} : memref<8x1024xf32, #tpu.memory_space<vmem>>, vector<1x32xf32>,
    %c8_i32_235 = arith.constant 8 : i32
    %337 = arith.muli %arg0, %c8_i32_235 : i32
    %c5_i32_236 = arith.constant 5 : i32
    %338 = arith.addi %337, %c5_i32_236 : i32
    %c8_i32_237 = arith.constant 8 : i32
    %339 = arith.muli %338, %c8_i32_237 : i32
    %c0_i32_238 = arith.constant 0 : i32
    %340 = arith.addi %339, %c0_i32_238 : i32
    %341 = arith.index_cast %340 : i32 to index
    %342 = memref.load %arg1[%341] : memref<64xi32, #tpu.memory_space<smem>>
    %c0_i32_239 = arith.constant 0 : i32
    %c15_i32_240 = arith.constant 15 : i32
    %343 = arith.maxsi %c0_i32_239, %342 : i32
    %344 = arith.minsi %c15_i32_240, %343 : i32
    %345 = arith.index_cast %344 : i32 to index
    %c0_241 = arith.constant 0 : index
    %346 = vector.load %arg2[%345, %c0_241] : memref<16x32xf32, #tpu.memory_space<vmem>>, vector<1x32xf32>
    %c5 = arith.constant 5 : index
    %c0_242 = arith.constant 0 : index
    %347 = vector.load %arg6[%c5, %c0_242] : memref<8x1024xf32, #tpu.memory_space<vmem>>, vector<1x32xf32>
    tpu.vector_store %arg6[%c5, %c0_242], %346 {strides = array<i32>} : memref<8x1024xf32, #tpu.memory_space<vmem>>, vector<1x32xf32>,
    %c1_i32_243 = arith.constant 1 : i32
    %348 = arith.addi %339, %c1_i32_243 : i32
    %349 = arith.index_cast %348 : i32 to index
    %350 = memref.load %arg1[%349] : memref<64xi32, #tpu.memory_space<smem>>
    %c0_i32_244 = arith.constant 0 : i32
    %c15_i32_245 = arith.constant 15 : i32
    %351 = arith.maxsi %c0_i32_244, %350 : i32
    %352 = arith.minsi %c15_i32_245, %351 : i32
    %353 = arith.index_cast %352 : i32 to index
    %c0_246 = arith.constant 0 : index
    %354 = vector.load %arg2[%353, %c0_246] : memref<16x32xf32, #tpu.memory_space<vmem>>, vector<1x32xf32>
    %c5_247 = arith.constant 5 : index
    %c128_248 = arith.constant 128 : index
    %355 = vector.load %arg6[%c5_247, %c128_248] : memref<8x1024xf32, #tpu.memory_space<vmem>>, vector<1x32xf32>
    tpu.vector_store %arg6[%c5_247, %c128_248], %354 {strides = array<i32>} : memref<8x1024xf32, #tpu.memory_space<vmem>>, vector<1x32xf32>,
    %c2_i32_249 = arith.constant 2 : i32
    %356 = arith.addi %339, %c2_i32_249 : i32
    %357 = arith.index_cast %356 : i32 to index
    %358 = memref.load %arg1[%357] : memref<64xi32, #tpu.memory_space<smem>>
    %c0_i32_250 = arith.constant 0 : i32
    %c15_i32_251 = arith.constant 15 : i32
    %359 = arith.maxsi %c0_i32_250, %358 : i32
    %360 = arith.minsi %c15_i32_251, %359 : i32
    %361 = arith.index_cast %360 : i32 to index
    %c0_252 = arith.constant 0 : index
    %362 = vector.load %arg2[%361, %c0_252] : memref<16x32xf32, #tpu.memory_space<vmem>>, vector<1x32xf32>
    %c5_253 = arith.constant 5 : index
    %c256_254 = arith.constant 256 : index
    %363 = vector.load %arg6[%c5_253, %c256_254] : memref<8x1024xf32, #tpu.memory_space<vmem>>, vector<1x32xf32>
    tpu.vector_store %arg6[%c5_253, %c256_254], %362 {strides = array<i32>} : memref<8x1024xf32, #tpu.memory_space<vmem>>, vector<1x32xf32>,
    %c3_i32_255 = arith.constant 3 : i32
    %364 = arith.addi %339, %c3_i32_255 : i32
    %365 = arith.index_cast %364 : i32 to index
    %366 = memref.load %arg1[%365] : memref<64xi32, #tpu.memory_space<smem>>
    %c0_i32_256 = arith.constant 0 : i32
    %c15_i32_257 = arith.constant 15 : i32
    %367 = arith.maxsi %c0_i32_256, %366 : i32
    %368 = arith.minsi %c15_i32_257, %367 : i32
    %369 = arith.index_cast %368 : i32 to index
    %c0_258 = arith.constant 0 : index
    %370 = vector.load %arg2[%369, %c0_258] : memref<16x32xf32, #tpu.memory_space<vmem>>, vector<1x32xf32>
    %c5_259 = arith.constant 5 : index
    %c384_260 = arith.constant 384 : index
    %371 = vector.load %arg6[%c5_259, %c384_260] : memref<8x1024xf32, #tpu.memory_space<vmem>>, vector<1x32xf32>
    tpu.vector_store %arg6[%c5_259, %c384_260], %370 {strides = array<i32>} : memref<8x1024xf32, #tpu.memory_space<vmem>>, vector<1x32xf32>,
    %c4_i32_261 = arith.constant 4 : i32
    %372 = arith.addi %339, %c4_i32_261 : i32
    %373 = arith.index_cast %372 : i32 to index
    %374 = memref.load %arg1[%373] : memref<64xi32, #tpu.memory_space<smem>>
    %c0_i32_262 = arith.constant 0 : i32
    %c15_i32_263 = arith.constant 15 : i32
    %375 = arith.maxsi %c0_i32_262, %374 : i32
    %376 = arith.minsi %c15_i32_263, %375 : i32
    %377 = arith.index_cast %376 : i32 to index
    %c0_264 = arith.constant 0 : index
    %378 = vector.load %arg2[%377, %c0_264] : memref<16x32xf32, #tpu.memory_space<vmem>>, vector<1x32xf32>
    %c5_265 = arith.constant 5 : index
    %c512_266 = arith.constant 512 : index
    %379 = vector.load %arg6[%c5_265, %c512_266] : memref<8x1024xf32, #tpu.memory_space<vmem>>, vector<1x32xf32>
    tpu.vector_store %arg6[%c5_265, %c512_266], %378 {strides = array<i32>} : memref<8x1024xf32, #tpu.memory_space<vmem>>, vector<1x32xf32>,
    %c5_i32_267 = arith.constant 5 : i32
    %380 = arith.addi %339, %c5_i32_267 : i32
    %381 = arith.index_cast %380 : i32 to index
    %382 = memref.load %arg1[%381] : memref<64xi32, #tpu.memory_space<smem>>
    %c0_i32_268 = arith.constant 0 : i32
    %c15_i32_269 = arith.constant 15 : i32
    %383 = arith.maxsi %c0_i32_268, %382 : i32
    %384 = arith.minsi %c15_i32_269, %383 : i32
    %385 = arith.index_cast %384 : i32 to index
    %c0_270 = arith.constant 0 : index
    %386 = vector.load %arg2[%385, %c0_270] : memref<16x32xf32, #tpu.memory_space<vmem>>, vector<1x32xf32>
    %c5_271 = arith.constant 5 : index
    %c640_272 = arith.constant 640 : index
    %387 = vector.load %arg6[%c5_271, %c640_272] : memref<8x1024xf32, #tpu.memory_space<vmem>>, vector<1x32xf32>
    tpu.vector_store %arg6[%c5_271, %c640_272], %386 {strides = array<i32>} : memref<8x1024xf32, #tpu.memory_space<vmem>>, vector<1x32xf32>,
    %c6_i32_273 = arith.constant 6 : i32
    %388 = arith.addi %339, %c6_i32_273 : i32
    %389 = arith.index_cast %388 : i32 to index
    %390 = memref.load %arg1[%389] : memref<64xi32, #tpu.memory_space<smem>>
    %c0_i32_274 = arith.constant 0 : i32
    %c15_i32_275 = arith.constant 15 : i32
    %391 = arith.maxsi %c0_i32_274, %390 : i32
    %392 = arith.minsi %c15_i32_275, %391 : i32
    %393 = arith.index_cast %392 : i32 to index
    %c0_276 = arith.constant 0 : index
    %394 = vector.load %arg2[%393, %c0_276] : memref<16x32xf32, #tpu.memory_space<vmem>>, vector<1x32xf32>
    %c5_277 = arith.constant 5 : index
    %c768_278 = arith.constant 768 : index
    %395 = vector.load %arg6[%c5_277, %c768_278] : memref<8x1024xf32, #tpu.memory_space<vmem>>, vector<1x32xf32>
    tpu.vector_store %arg6[%c5_277, %c768_278], %394 {strides = array<i32>} : memref<8x1024xf32, #tpu.memory_space<vmem>>, vector<1x32xf32>,
    %c7_i32_279 = arith.constant 7 : i32
    %396 = arith.addi %339, %c7_i32_279 : i32
    %397 = arith.index_cast %396 : i32 to index
    %398 = memref.load %arg1[%397] : memref<64xi32, #tpu.memory_space<smem>>
    %c0_i32_280 = arith.constant 0 : i32
    %c15_i32_281 = arith.constant 15 : i32
    %399 = arith.maxsi %c0_i32_280, %398 : i32
    %400 = arith.minsi %c15_i32_281, %399 : i32
    %401 = arith.index_cast %400 : i32 to index
    %c0_282 = arith.constant 0 : index
    %402 = vector.load %arg2[%401, %c0_282] : memref<16x32xf32, #tpu.memory_space<vmem>>, vector<1x32xf32>
    %c5_283 = arith.constant 5 : index
    %c896_284 = arith.constant 896 : index
    %403 = vector.load %arg6[%c5_283, %c896_284] : memref<8x1024xf32, #tpu.memory_space<vmem>>, vector<1x32xf32>
    tpu.vector_store %arg6[%c5_283, %c896_284], %402 {strides = array<i32>} : memref<8x1024xf32, #tpu.memory_space<vmem>>, vector<1x32xf32>,
    %c8_i32_285 = arith.constant 8 : i32
    %404 = arith.muli %arg0, %c8_i32_285 : i32
    %c6_i32_286 = arith.constant 6 : i32
    %405 = arith.addi %404, %c6_i32_286 : i32
    %c8_i32_287 = arith.constant 8 : i32
    %406 = arith.muli %405, %c8_i32_287 : i32
    %c0_i32_288 = arith.constant 0 : i32
    %407 = arith.addi %406, %c0_i32_288 : i32
    %408 = arith.index_cast %407 : i32 to index
    %409 = memref.load %arg1[%408] : memref<64xi32, #tpu.memory_space<smem>>
    %c0_i32_289 = arith.constant 0 : i32
    %c15_i32_290 = arith.constant 15 : i32
    %410 = arith.maxsi %c0_i32_289, %409 : i32
    %411 = arith.minsi %c15_i32_290, %410 : i32
    %412 = arith.index_cast %411 : i32 to index
    %c0_291 = arith.constant 0 : index
    %413 = vector.load %arg2[%412, %c0_291] : memref<16x32xf32, #tpu.memory_space<vmem>>, vector<1x32xf32>
    %c6 = arith.constant 6 : index
    %c0_292 = arith.constant 0 : index
    %414 = vector.load %arg6[%c6, %c0_292] : memref<8x1024xf32, #tpu.memory_space<vmem>>, vector<1x32xf32>
    tpu.vector_store %arg6[%c6, %c0_292], %413 {strides = array<i32>} : memref<8x1024xf32, #tpu.memory_space<vmem>>, vector<1x32xf32>,
    %c1_i32_293 = arith.constant 1 : i32
    %415 = arith.addi %406, %c1_i32_293 : i32
    %416 = arith.index_cast %415 : i32 to index
    %417 = memref.load %arg1[%416] : memref<64xi32, #tpu.memory_space<smem>>
    %c0_i32_294 = arith.constant 0 : i32
    %c15_i32_295 = arith.constant 15 : i32
    %418 = arith.maxsi %c0_i32_294, %417 : i32
    %419 = arith.minsi %c15_i32_295, %418 : i32
    %420 = arith.index_cast %419 : i32 to index
    %c0_296 = arith.constant 0 : index
    %421 = vector.load %arg2[%420, %c0_296] : memref<16x32xf32, #tpu.memory_space<vmem>>, vector<1x32xf32>
    %c6_297 = arith.constant 6 : index
    %c128_298 = arith.constant 128 : index
    %422 = vector.load %arg6[%c6_297, %c128_298] : memref<8x1024xf32, #tpu.memory_space<vmem>>, vector<1x32xf32>
    tpu.vector_store %arg6[%c6_297, %c128_298], %421 {strides = array<i32>} : memref<8x1024xf32, #tpu.memory_space<vmem>>, vector<1x32xf32>,
    %c2_i32_299 = arith.constant 2 : i32
    %423 = arith.addi %406, %c2_i32_299 : i32
    %424 = arith.index_cast %423 : i32 to index
    %425 = memref.load %arg1[%424] : memref<64xi32, #tpu.memory_space<smem>>
    %c0_i32_300 = arith.constant 0 : i32
    %c15_i32_301 = arith.constant 15 : i32
    %426 = arith.maxsi %c0_i32_300, %425 : i32
    %427 = arith.minsi %c15_i32_301, %426 : i32
    %428 = arith.index_cast %427 : i32 to index
    %c0_302 = arith.constant 0 : index
    %429 = vector.load %arg2[%428, %c0_302] : memref<16x32xf32, #tpu.memory_space<vmem>>, vector<1x32xf32>
    %c6_303 = arith.constant 6 : index
    %c256_304 = arith.constant 256 : index
    %430 = vector.load %arg6[%c6_303, %c256_304] : memref<8x1024xf32, #tpu.memory_space<vmem>>, vector<1x32xf32>
    tpu.vector_store %arg6[%c6_303, %c256_304], %429 {strides = array<i32>} : memref<8x1024xf32, #tpu.memory_space<vmem>>, vector<1x32xf32>,
    %c3_i32_305 = arith.constant 3 : i32
    %431 = arith.addi %406, %c3_i32_305 : i32
    %432 = arith.index_cast %431 : i32 to index
    %433 = memref.load %arg1[%432] : memref<64xi32, #tpu.memory_space<smem>>
    %c0_i32_306 = arith.constant 0 : i32
    %c15_i32_307 = arith.constant 15 : i32
    %434 = arith.maxsi %c0_i32_306, %433 : i32
    %435 = arith.minsi %c15_i32_307, %434 : i32
    %436 = arith.index_cast %435 : i32 to index
    %c0_308 = arith.constant 0 : index
    %437 = vector.load %arg2[%436, %c0_308] : memref<16x32xf32, #tpu.memory_space<vmem>>, vector<1x32xf32>
    %c6_309 = arith.constant 6 : index
    %c384_310 = arith.constant 384 : index
    %438 = vector.load %arg6[%c6_309, %c384_310] : memref<8x1024xf32, #tpu.memory_space<vmem>>, vector<1x32xf32>
    tpu.vector_store %arg6[%c6_309, %c384_310], %437 {strides = array<i32>} : memref<8x1024xf32, #tpu.memory_space<vmem>>, vector<1x32xf32>,
    %c4_i32_311 = arith.constant 4 : i32
    %439 = arith.addi %406, %c4_i32_311 : i32
    %440 = arith.index_cast %439 : i32 to index
    %441 = memref.load %arg1[%440] : memref<64xi32, #tpu.memory_space<smem>>
    %c0_i32_312 = arith.constant 0 : i32
    %c15_i32_313 = arith.constant 15 : i32
    %442 = arith.maxsi %c0_i32_312, %441 : i32
    %443 = arith.minsi %c15_i32_313, %442 : i32
    %444 = arith.index_cast %443 : i32 to index
    %c0_314 = arith.constant 0 : index
    %445 = vector.load %arg2[%444, %c0_314] : memref<16x32xf32, #tpu.memory_space<vmem>>, vector<1x32xf32>
    %c6_315 = arith.constant 6 : index
    %c512_316 = arith.constant 512 : index
    %446 = vector.load %arg6[%c6_315, %c512_316] : memref<8x1024xf32, #tpu.memory_space<vmem>>, vector<1x32xf32>
    tpu.vector_store %arg6[%c6_315, %c512_316], %445 {strides = array<i32>} : memref<8x1024xf32, #tpu.memory_space<vmem>>, vector<1x32xf32>,
    %c5_i32_317 = arith.constant 5 : i32
    %447 = arith.addi %406, %c5_i32_317 : i32
    %448 = arith.index_cast %447 : i32 to index
    %449 = memref.load %arg1[%448] : memref<64xi32, #tpu.memory_space<smem>>
    %c0_i32_318 = arith.constant 0 : i32
    %c15_i32_319 = arith.constant 15 : i32
    %450 = arith.maxsi %c0_i32_318, %449 : i32
    %451 = arith.minsi %c15_i32_319, %450 : i32
    %452 = arith.index_cast %451 : i32 to index
    %c0_320 = arith.constant 0 : index
    %453 = vector.load %arg2[%452, %c0_320] : memref<16x32xf32, #tpu.memory_space<vmem>>, vector<1x32xf32>
    %c6_321 = arith.constant 6 : index
    %c640_322 = arith.constant 640 : index
    %454 = vector.load %arg6[%c6_321, %c640_322] : memref<8x1024xf32, #tpu.memory_space<vmem>>, vector<1x32xf32>
    tpu.vector_store %arg6[%c6_321, %c640_322], %453 {strides = array<i32>} : memref<8x1024xf32, #tpu.memory_space<vmem>>, vector<1x32xf32>,
    %c6_i32_323 = arith.constant 6 : i32
    %455 = arith.addi %406, %c6_i32_323 : i32
    %456 = arith.index_cast %455 : i32 to index
    %457 = memref.load %arg1[%456] : memref<64xi32, #tpu.memory_space<smem>>
    %c0_i32_324 = arith.constant 0 : i32
    %c15_i32_325 = arith.constant 15 : i32
    %458 = arith.maxsi %c0_i32_324, %457 : i32
    %459 = arith.minsi %c15_i32_325, %458 : i32
    %460 = arith.index_cast %459 : i32 to index
    %c0_326 = arith.constant 0 : index
    %461 = vector.load %arg2[%460, %c0_326] : memref<16x32xf32, #tpu.memory_space<vmem>>, vector<1x32xf32>
    %c6_327 = arith.constant 6 : index
    %c768_328 = arith.constant 768 : index
    %462 = vector.load %arg6[%c6_327, %c768_328] : memref<8x1024xf32, #tpu.memory_space<vmem>>, vector<1x32xf32>
    tpu.vector_store %arg6[%c6_327, %c768_328], %461 {strides = array<i32>} : memref<8x1024xf32, #tpu.memory_space<vmem>>, vector<1x32xf32>,
    %c7_i32_329 = arith.constant 7 : i32
    %463 = arith.addi %406, %c7_i32_329 : i32
    %464 = arith.index_cast %463 : i32 to index
    %465 = memref.load %arg1[%464] : memref<64xi32, #tpu.memory_space<smem>>
    %c0_i32_330 = arith.constant 0 : i32
    %c15_i32_331 = arith.constant 15 : i32
    %466 = arith.maxsi %c0_i32_330, %465 : i32
    %467 = arith.minsi %c15_i32_331, %466 : i32
    %468 = arith.index_cast %467 : i32 to index
    %c0_332 = arith.constant 0 : index
    %469 = vector.load %arg2[%468, %c0_332] : memref<16x32xf32, #tpu.memory_space<vmem>>, vector<1x32xf32>
    %c6_333 = arith.constant 6 : index
    %c896_334 = arith.constant 896 : index
    %470 = vector.load %arg6[%c6_333, %c896_334] : memref<8x1024xf32, #tpu.memory_space<vmem>>, vector<1x32xf32>
    tpu.vector_store %arg6[%c6_333, %c896_334], %469 {strides = array<i32>} : memref<8x1024xf32, #tpu.memory_space<vmem>>, vector<1x32xf32>,
    %c8_i32_335 = arith.constant 8 : i32
    %471 = arith.muli %arg0, %c8_i32_335 : i32
    %c7_i32_336 = arith.constant 7 : i32
    %472 = arith.addi %471, %c7_i32_336 : i32
    %c8_i32_337 = arith.constant 8 : i32
    %473 = arith.muli %472, %c8_i32_337 : i32
    %c0_i32_338 = arith.constant 0 : i32
    %474 = arith.addi %473, %c0_i32_338 : i32
    %475 = arith.index_cast %474 : i32 to index
    %476 = memref.load %arg1[%475] : memref<64xi32, #tpu.memory_space<smem>>
    %c0_i32_339 = arith.constant 0 : i32
    %c15_i32_340 = arith.constant 15 : i32
    %477 = arith.maxsi %c0_i32_339, %476 : i32
    %478 = arith.minsi %c15_i32_340, %477 : i32
    %479 = arith.index_cast %478 : i32 to index
    %c0_341 = arith.constant 0 : index
    %480 = vector.load %arg2[%479, %c0_341] : memref<16x32xf32, #tpu.memory_space<vmem>>, vector<1x32xf32>
    %c7 = arith.constant 7 : index
    %c0_342 = arith.constant 0 : index
    %481 = vector.load %arg6[%c7, %c0_342] : memref<8x1024xf32, #tpu.memory_space<vmem>>, vector<1x32xf32>
    tpu.vector_store %arg6[%c7, %c0_342], %480 {strides = array<i32>} : memref<8x1024xf32, #tpu.memory_space<vmem>>, vector<1x32xf32>,
    %c1_i32_343 = arith.constant 1 : i32
    %482 = arith.addi %473, %c1_i32_343 : i32
    %483 = arith.index_cast %482 : i32 to index
    %484 = memref.load %arg1[%483] : memref<64xi32, #tpu.memory_space<smem>>
    %c0_i32_344 = arith.constant 0 : i32
    %c15_i32_345 = arith.constant 15 : i32
    %485 = arith.maxsi %c0_i32_344, %484 : i32
    %486 = arith.minsi %c15_i32_345, %485 : i32
    %487 = arith.index_cast %486 : i32 to index
    %c0_346 = arith.constant 0 : index
    %488 = vector.load %arg2[%487, %c0_346] : memref<16x32xf32, #tpu.memory_space<vmem>>, vector<1x32xf32>
    %c7_347 = arith.constant 7 : index
    %c128_348 = arith.constant 128 : index
    %489 = vector.load %arg6[%c7_347, %c128_348] : memref<8x1024xf32, #tpu.memory_space<vmem>>, vector<1x32xf32>
    tpu.vector_store %arg6[%c7_347, %c128_348], %488 {strides = array<i32>} : memref<8x1024xf32, #tpu.memory_space<vmem>>, vector<1x32xf32>,
    %c2_i32_349 = arith.constant 2 : i32
    %490 = arith.addi %473, %c2_i32_349 : i32
    %491 = arith.index_cast %490 : i32 to index
    %492 = memref.load %arg1[%491] : memref<64xi32, #tpu.memory_space<smem>>
    %c0_i32_350 = arith.constant 0 : i32
    %c15_i32_351 = arith.constant 15 : i32
    %493 = arith.maxsi %c0_i32_350, %492 : i32
    %494 = arith.minsi %c15_i32_351, %493 : i32
    %495 = arith.index_cast %494 : i32 to index
    %c0_352 = arith.constant 0 : index
    %496 = vector.load %arg2[%495, %c0_352] : memref<16x32xf32, #tpu.memory_space<vmem>>, vector<1x32xf32>
    %c7_353 = arith.constant 7 : index
    %c256_354 = arith.constant 256 : index
    %497 = vector.load %arg6[%c7_353, %c256_354] : memref<8x1024xf32, #tpu.memory_space<vmem>>, vector<1x32xf32>
    tpu.vector_store %arg6[%c7_353, %c256_354], %496 {strides = array<i32>} : memref<8x1024xf32, #tpu.memory_space<vmem>>, vector<1x32xf32>,
    %c3_i32_355 = arith.constant 3 : i32
    %498 = arith.addi %473, %c3_i32_355 : i32
    %499 = arith.index_cast %498 : i32 to index
    %500 = memref.load %arg1[%499] : memref<64xi32, #tpu.memory_space<smem>>
    %c0_i32_356 = arith.constant 0 : i32
    %c15_i32_357 = arith.constant 15 : i32
    %501 = arith.maxsi %c0_i32_356, %500 : i32
    %502 = arith.minsi %c15_i32_357, %501 : i32
    %503 = arith.index_cast %502 : i32 to index
    %c0_358 = arith.constant 0 : index
    %504 = vector.load %arg2[%503, %c0_358] : memref<16x32xf32, #tpu.memory_space<vmem>>, vector<1x32xf32>
    %c7_359 = arith.constant 7 : index
    %c384_360 = arith.constant 384 : index
    %505 = vector.load %arg6[%c7_359, %c384_360] : memref<8x1024xf32, #tpu.memory_space<vmem>>, vector<1x32xf32>
    tpu.vector_store %arg6[%c7_359, %c384_360], %504 {strides = array<i32>} : memref<8x1024xf32, #tpu.memory_space<vmem>>, vector<1x32xf32>,
    %c4_i32_361 = arith.constant 4 : i32
    %506 = arith.addi %473, %c4_i32_361 : i32
    %507 = arith.index_cast %506 : i32 to index
    %508 = memref.load %arg1[%507] : memref<64xi32, #tpu.memory_space<smem>>
    %c0_i32_362 = arith.constant 0 : i32
    %c15_i32_363 = arith.constant 15 : i32
    %509 = arith.maxsi %c0_i32_362, %508 : i32
    %510 = arith.minsi %c15_i32_363, %509 : i32
    %511 = arith.index_cast %510 : i32 to index
    %c0_364 = arith.constant 0 : index
    %512 = vector.load %arg2[%511, %c0_364] : memref<16x32xf32, #tpu.memory_space<vmem>>, vector<1x32xf32>
    %c7_365 = arith.constant 7 : index
    %c512_366 = arith.constant 512 : index
    %513 = vector.load %arg6[%c7_365, %c512_366] : memref<8x1024xf32, #tpu.memory_space<vmem>>, vector<1x32xf32>
    tpu.vector_store %arg6[%c7_365, %c512_366], %512 {strides = array<i32>} : memref<8x1024xf32, #tpu.memory_space<vmem>>, vector<1x32xf32>,
    %c5_i32_367 = arith.constant 5 : i32
    %514 = arith.addi %473, %c5_i32_367 : i32
    %515 = arith.index_cast %514 : i32 to index
    %516 = memref.load %arg1[%515] : memref<64xi32, #tpu.memory_space<smem>>
    %c0_i32_368 = arith.constant 0 : i32
    %c15_i32_369 = arith.constant 15 : i32
    %517 = arith.maxsi %c0_i32_368, %516 : i32
    %518 = arith.minsi %c15_i32_369, %517 : i32
    %519 = arith.index_cast %518 : i32 to index
    %c0_370 = arith.constant 0 : index
    %520 = vector.load %arg2[%519, %c0_370] : memref<16x32xf32, #tpu.memory_space<vmem>>, vector<1x32xf32>
    %c7_371 = arith.constant 7 : index
    %c640_372 = arith.constant 640 : index
    %521 = vector.load %arg6[%c7_371, %c640_372] : memref<8x1024xf32, #tpu.memory_space<vmem>>, vector<1x32xf32>
    tpu.vector_store %arg6[%c7_371, %c640_372], %520 {strides = array<i32>} : memref<8x1024xf32, #tpu.memory_space<vmem>>, vector<1x32xf32>,
    %c6_i32_373 = arith.constant 6 : i32
    %522 = arith.addi %473, %c6_i32_373 : i32
    %523 = arith.index_cast %522 : i32 to index
    %524 = memref.load %arg1[%523] : memref<64xi32, #tpu.memory_space<smem>>
    %c0_i32_374 = arith.constant 0 : i32
    %c15_i32_375 = arith.constant 15 : i32
    %525 = arith.maxsi %c0_i32_374, %524 : i32
    %526 = arith.minsi %c15_i32_375, %525 : i32
    %527 = arith.index_cast %526 : i32 to index
    %c0_376 = arith.constant 0 : index
    %528 = vector.load %arg2[%527, %c0_376] : memref<16x32xf32, #tpu.memory_space<vmem>>, vector<1x32xf32>
    %c7_377 = arith.constant 7 : index
    %c768_378 = arith.constant 768 : index
    %529 = vector.load %arg6[%c7_377, %c768_378] : memref<8x1024xf32, #tpu.memory_space<vmem>>, vector<1x32xf32>
    tpu.vector_store %arg6[%c7_377, %c768_378], %528 {strides = array<i32>} : memref<8x1024xf32, #tpu.memory_space<vmem>>, vector<1x32xf32>,
    %c7_i32_379 = arith.constant 7 : i32
    %530 = arith.addi %473, %c7_i32_379 : i32
    %531 = arith.index_cast %530 : i32 to index
    %532 = memref.load %arg1[%531] : memref<64xi32, #tpu.memory_space<smem>>
    %c0_i32_380 = arith.constant 0 : i32
    %c15_i32_381 = arith.constant 15 : i32
    %533 = arith.maxsi %c0_i32_380, %532 : i32
    %534 = arith.minsi %c15_i32_381, %533 : i32
    %535 = arith.index_cast %534 : i32 to index
    %c0_382 = arith.constant 0 : index
    %536 = vector.load %arg2[%535, %c0_382] : memref<16x32xf32, #tpu.memory_space<vmem>>, vector<1x32xf32>
    %c7_383 = arith.constant 7 : index
    %c896_384 = arith.constant 896 : index
    %537 = vector.load %arg6[%c7_383, %c896_384] : memref<8x1024xf32, #tpu.memory_space<vmem>>, vector<1x32xf32>
    tpu.vector_store %arg6[%c7_383, %c896_384], %536 {strides = array<i32>} : memref<8x1024xf32, #tpu.memory_space<vmem>>, vector<1x32xf32>,
    %c0_385 = arith.constant 0 : index
    %c0_386 = arith.constant 0 : index
    %538 = vector.load %arg6[%c0_385, %c0_386] : memref<8x1024xf32, #tpu.memory_space<vmem>>, vector<8x1024xf32>
    %539 = arith.truncf %538 : vector<8x1024xf32> to vector<8x1024xbf16>
    %c0_387 = arith.constant 0 : index
    %c0_388 = arith.constant 0 : index
    %540 = vector.load %arg3[%c0_387, %c0_388] : memref<1024x128xbf16, #tpu.memory_space<vmem>>, vector<1024x128xbf16>
    %cst_389 = arith.constant dense<0.000000e+00> : vector<8x128xf32>
    %541 = tpu.matmul %539, %540, %cst_389 {dimension_numbers = #tpu.dot_dimension_numbers<[1], [0], [0], [1], [0, 0, 1, 1], [], []>} : vector<8x1024xbf16>, vector<1024x128xbf16>, vector<8x128xf32> -> vector<8x128xf32>
    %c0_390 = arith.constant 0 : index
    %c0_391 = arith.constant 0 : index
    %542 = vector.load %arg4[%c0_390, %c0_391] : memref<1x128xf32, #tpu.memory_space<vmem>>, vector<1x128xf32>
    %543 = vector.broadcast %542 : vector<1x128xf32> to vector<8x128xf32>
    %544 = arith.addf %541, %543 : vector<8x128xf32>
    %c0_392 = arith.constant 0 : index
    %c0_393 = arith.constant 0 : index
    %545 = vector.load %arg5[%c0_392, %c0_393] : memref<8x128xf32, #tpu.memory_space<vmem>>, vector<8x128xf32>
    tpu.vector_store %arg5[%c0_392, %c0_393], %544 {strides = array<i32>} : memref<8x128xf32, #tpu.memory_space<vmem>>, vector<8x128xf32>,
    return
  }
  func.func @transform_0(%arg0: i32, %arg1: memref<64xi32, #tpu.memory_space<smem>>) -> (i32, i32) {
    %c0_i32 = arith.constant 0 : i32
    %c0_i32_0 = arith.constant 0 : i32
    %c0_i32_1 = arith.constant 0 : i32
    return %c0_i32, %c0_i32_0 : i32, i32
  }
  func.func @transform_1(%arg0: i32, %arg1: memref<64xi32, #tpu.memory_space<smem>>) -> (i32, i32) {
    %c0_i32 = arith.constant 0 : i32
    %c0_i32_0 = arith.constant 0 : i32
    %c0_i32_1 = arith.constant 0 : i32
    return %c0_i32, %c0_i32_0 : i32, i32
  }
  func.func @transform_2(%arg0: i32, %arg1: memref<64xi32, #tpu.memory_space<smem>>) -> (i32, i32) {
    %c0_i32 = arith.constant 0 : i32
    %c0_i32_0 = arith.constant 0 : i32
    %c0_i32_1 = arith.constant 0 : i32
    return %c0_i32, %c0_i32_0 : i32, i32
  }
  func.func @transform_3(%arg0: i32, %arg1: memref<64xi32, #tpu.memory_space<smem>>) -> (i32, i32) {
    %c0_i32 = arith.constant 0 : i32
    %c0_i32_0 = arith.constant 0 : i32
    return %arg0, %c0_i32 : i32, i32
  }
}

</mosaic_0001>

<bundles_post_ra>
// kernel: tpu_custom_call.1
= control target key start
LH: loop header
LB: loop body
LE: loop exit
PB: predicated region body
PF: predicated region fallthrough
CT: control target
= control target key end

     0   :  { %s2301_s18 = smov [#allocation4]   ;;  %s2649_s0 = inlined_call_operand.hbm [shape: s32[64], index: 0, kind: input, shape index: {}]   ;;  %s2650_s1 = inlined_call_operand.hbm [shape: f32[16,32], index: 1, kind: input, shape index: {}]   ;;  %s2651_s2 = inlined_call_operand.hbm [shape: bf16[1024,128], index: 2, kind: input, shape index: {}]   ;;  %s2652_s3 = inlined_call_operand.vmem [shape: f32[1,128], index: 3, kind: input, shape index: {}]   ;;  %s2653_s4 = inlined_call_operand.hbm [shape: f32[8,128], index: 4, kind: output, shape index: {}]  }
   0x1   :  { %s10_s17 = sshll.u32 %s2649_s0, 4  ;;  %s11_s17 = int_to_ptr.hbm [resolvable:$true] %s10_s17 }
   0x2   :  { %13 = dma.hbm_to_smem %s11_s17, 16, %s2301_s18, [#allocation3] }
   0x3   :  { %2293 = dma.done.wait [#allocation3], 16 }
   0x4   :  { %2294 = vsyncadd [#allocation3], 4294967280 }
   0x5   :  { %16 = sfence }
   0x6   :  { %17 = vsyncpa [#allocation6], 0 }
   0x7   :  { %18 = vsyncpa [#allocation9], 0 }
   0x8   :  { %19 = vsyncpa [#allocation7], 0  ;;  %s24_s21 = sshll.u32 %s2650_s1, 4  ;;  %s2302_s22 = smov [#allocation5]   ;;  %s25_s21 = int_to_ptr.hbm [resolvable:$true] %s24_s21 }
   0x9   :  { %s26_s23 = sshll.u32 %s2302_s22, 4  ;;  %s37_s0 = sshll.u32 %s2651_s2, 4  ;;  %s27_s23 = int_to_ptr.vmem [resolvable:$true] %s26_s23  ;;  %s38_s0 = int_to_ptr.hbm [resolvable:$true] %s37_s0 }
   0xa   :  { %s2303_s26 = smov 128   ;;  %s2304_s27 = smov 8  }
   0xb   :  { %32 = dma.hbm_to_vmem [thread:$0]  %s25_s21, 256, %s27_s23, [#allocation6], %s2303_s26, %s2303_s26, %s2304_s27  }
   0xc   :  { %s2305_s28 = smov [#allocation8]   ;;  %s2306_s30 = smov 64  }
   0xd   :  { %s39_s29 = sshll.u32 %s2305_s28, 4  ;;  %s2307_s5 = smov 4   ;;  %s40_s29 = int_to_ptr.vmem [resolvable:$true] %s39_s29 }
   0xe   :  { %45 = dma.hbm_to_vmem [thread:$0]  %s38_s0, 8192, %s40_s29, [#allocation9], %s2306_s30, %s2306_s30, %s2307_s5  }
   0xf   :  { %2295 = dma.done.wait [#allocation6], 256  }
  0x10   :  { %2296 = vsyncadd [#allocation6], 4294967040 }
  0x11   :  { %2297 = dma.done.wait [#allocation9], 8192  }
  0x12   :  { %2298 = vsyncadd [#allocation9], 4294959104  ;;  %s2344_s1 = sld [smem:[#allocation4 + $0x2]]  ;;  %v2308_v0 = vmov 0.0   ;;  %v2142_v1 = vld [vmem:[#allocation8 + $0x38] sm:$0xff]  ;;  %v2141_v5 = vld [vmem:[#allocation8 + $0x30] sm:$0xff] }
  0x13   :  { %s2346_s6 = sld [smem:[#allocation4 + $0xa]]  ;;  %58 = vst [vmem:[#allocation2 + $0x10] sm:$0xff] %v2308_v0  ;;  %v2150_v2 = vld [vmem:[#allocation8 + $0x78] sm:$0xff]  ;;  %1181 = vmatpush.bf16.msra.mxu0 %v2142_v1  ;;  %v2149_v6 = vld [vmem:[#allocation8 + $0x70] sm:$0xff]  ;;  %v2140_v9 = vld [vmem:[#allocation8 + $0x28] sm:$0xff]  ;;  %vm72_vm0 = vcmask 253952  }
  0x14   :  { %s2348_s2 = sld [smem:[#allocation4 + $0x12]]  ;;  %56 = vst [vmem:[#allocation2] sm:$0xff] %v2308_v0  ;;  %v2158_v3 = vld [vmem:[#allocation8 + $0xb8] sm:$0xff]  ;;  %1194 = vmatpush.bf16.msra.mxu1 %v2150_v2  ;;  %v2157_v7 = vld [vmem:[#allocation8 + $0xb0] sm:$0xff]  ;;  %v2148_v10 = vld [vmem:[#allocation8 + $0x68] sm:$0xff] }
  0x15   :  { %s2350_s7 = sld [smem:[#allocation4 + $0x1a]]  ;;  %57 = vst [vmem:[#allocation2 + $0x8] sm:$0xff] %v2308_v0  ;;  %v2166_v4 = vld [vmem:[#allocation8 + $0xf8] sm:$0xff]  ;;  %1207 = vmatpush.bf16.msra.mxu2 %v2158_v3  ;;  %v2165_v8 = vld [vmem:[#allocation8 + $0xf0] sm:$0xff]  ;;  %v2156_v11 = vld [vmem:[#allocation8 + $0xa8] sm:$0xff] }
  0x16   :  { %s2352_s8 = sld [smem:[#allocation4 + $0x22]]  ;;  %59 = vst [vmem:[#allocation2 + $0x18] sm:$0xff] %v2308_v0  ;;  %1220 = vmatpush.bf16.msra.mxu3 %v2166_v4  ;;  %v2164_v12 = vld [vmem:[#allocation8 + $0xe8] sm:$0xff]  ;;  %v2139_v13 = vld [vmem:[#allocation8 + $0x20] sm:$0xff]  ;;  %v2138_v17 = vld [vmem:[#allocation8 + $0x18] sm:$0xff] }
  0x17   :  { %s2354_s9 = sld [smem:[#allocation4 + $0x2a]]  ;;  %60 = vst [vmem:[#allocation2 + $0x20] sm:$0xff] %v2308_v0  ;;  %1182 = vmatpush.bf16.msra.mxu0 %v2141_v5  ;;  %v2147_v14 = vld [vmem:[#allocation8 + $0x60] sm:$0xff]  ;;  %v2146_v18 = vld [vmem:[#allocation8 + $0x58] sm:$0xff]  ;;  %v2137_v25 = vld [vmem:[#allocation8 + $0x10] sm:$0xff] }
  0x18   :  { %p85_p0 = scmp.gt.s32.totalorder %s2344_s1, 0  ;;  %p1380_p1 = scmp.lt.s32.totalorder %s2344_s1, 15  ;;  %61 = vst [vmem:[#allocation2 + $0x28] sm:$0xff] %v2308_v0  ;;  %1195 = vmatpush.bf16.msra.mxu1 %v2149_v6  ;;  %v2155_v15 = vld [vmem:[#allocation8 + $0xa0] sm:$0xff]  ;;  %v2154_v19 = vld [vmem:[#allocation8 + $0x98] sm:$0xff]  ;;  %v2145_v26 = vld [vmem:[#allocation8 + $0x50] sm:$0xff] }
  0x19   :  { %p159_p2 = scmp.gt.s32.totalorder %s2346_s6, 0  ;;  %p1428_p3 = scmp.lt.s32.totalorder %s2346_s6, 15  ;;  %62 = vst [vmem:[#allocation2 + $0x30] sm:$0xff] %v2308_v0  ;;  %1208 = vmatpush.bf16.msra.mxu2 %v2157_v7  ;;  %v2163_v16 = vld [vmem:[#allocation8 + $0xe0] sm:$0xff]  ;;  %v2162_v22 = vld [vmem:[#allocation8 + $0xd8] sm:$0xff]  ;;  %v2153_v27 = vld [vmem:[#allocation8 + $0x90] sm:$0xff] }
  0x1a   :  { %s86_s10 = scalar_select %p85_p0, %s2344_s1, 0  ;;  %63 = vst [vmem:[#allocation2 + $0x38] sm:$0xff] %v2308_v0  ;;  %1221 = vmatpush.bf16.msra.mxu3 %v2165_v8  ;;  %v2161_v28 = vld [vmem:[#allocation8 + $0xd0] sm:$0xff]  ;;  %v2136_v30 = vld [vmem:[#allocation8 + $0x8] sm:$0xff]  ;;  %v2135_v35 = vld [vmem:[#allocation8] sm:$0xff] }
  0x1b   :  { %s160_s11 = scalar_select %p159_p2, %s2346_s6, 0  ;;  %1183 = vmatpush.bf16.msra.mxu0 %v2140_v9  ;;  %v2144_v31 = vld [vmem:[#allocation8 + $0x48] sm:$0xff]  ;;  %v2143_v36 = vld [vmem:[#allocation8 + $0x40] sm:$0xff]  ;;  %v2174_v39 = vld [vmem:[#allocation8 + $0x138] sm:$0xff] }
  0x1c   :  { %s2655_s10 = smov (!%p1380_p1, %s86_s10), 15  ;;  %p232_p4 = scmp.gt.s32.totalorder %s2348_s2, 0  ;;  %1196 = vmatpush.bf16.msra.mxu1 %v2148_v10  ;;  %v2152_v32 = vld [vmem:[#allocation8 + $0x88] sm:$0xff]  ;;  %v2151_v37 = vld [vmem:[#allocation8 + $0x80] sm:$0xff]  ;;  %v2182_v40 = vld [vmem:[#allocation8 + $0x178] sm:$0xff] }
  0x1d   :  { %s2657_s11 = smov (!%p1428_p3, %s160_s11), 15  ;;  %p1476_p5 = scmp.lt.s32.totalorder %s2348_s2, 15  ;;  %1209 = vmatpush.bf16.msra.mxu2 %v2156_v11  ;;  %v2160_v33 = vld [vmem:[#allocation8 + $0xc8] sm:$0xff]  ;;  %v2159_v38 = vld [vmem:[#allocation8 + $0xc0] sm:$0xff]  ;;  %v2190_v41 = vld [vmem:[#allocation8 + $0x1b8] sm:$0xff] }
  0x1e   :  { %s2659_s2 = smov (!%p232_p4, %s2348_s2), 0  ;;  %p305_p6 = scmp.gt.s32.totalorder %s2350_s7, 0  ;;  %1222 = vmatpush.bf16.msra.mxu3 %v2164_v12  ;;  %v2198_v42 = vld [vmem:[#allocation8 + $0x1f8] sm:$0xff]  ;;  %v2173_v43 = vld [vmem:[#allocation8 + $0x130] sm:$0xff]  ;;  %v2172_v54 = vld [vmem:[#allocation8 + $0x128] sm:$0xff] }
  0x1f   :  { %p1524_p7 = scmp.lt.s32.totalorder %s2350_s7, 15  ;;  %s2661_s2 = smov (!%p1476_p5, %s2659_s2), 15  ;;  %1184 = vmatpush.bf16.msra.mxu0 %v2139_v13  ;;  %v2181_v44 = vld [vmem:[#allocation8 + $0x170] sm:$0xff]  ;;  %v2180_v55 = vld [vmem:[#allocation8 + $0x168] sm:$0xff]  ;;  %v2171_v3 = vld [vmem:[#allocation8 + $0x120] sm:$0xff] }
  0x20   :  { %s306_s12 = scalar_select %p305_p6, %s2350_s7, 0  ;;  %1197 = vmatpush.bf16.msra.mxu1 %v2147_v14  ;;  %v2189_v46 = vld [vmem:[#allocation8 + $0x1b0] sm:$0xff]  ;;  %v2188_v56 = vld [vmem:[#allocation8 + $0x1a8] sm:$0xff]  ;;  %v2179_v4 = vld [vmem:[#allocation8 + $0x160] sm:$0xff] }
  0x21   :  { %p378_p8 = scmp.gt.s32.totalorder %s2352_s8, 0  ;;  %s89_s13 = scalar_lea.vmem [#allocation5], %s2655_s10  ;;  %1210 = vmatpush.bf16.msra.mxu2 %v2155_v15  ;;  %v2197_v47 = vld [vmem:[#allocation8 + $0x1f0] sm:$0xff]  ;;  %v2196_v57 = vld [vmem:[#allocation8 + $0x1e8] sm:$0xff]  ;;  %v2187_v5 = vld [vmem:[#allocation8 + $0x1a0] sm:$0xff] }
  0x22   :  { %v90_v20 = vld [vmem:[%s89_s13] sm:$0x1]  ;;  %s163_s14 = scalar_lea.vmem [#allocation5], %s2657_s11  ;;  %s2663_s12 = smov (!%p1524_p7, %s306_s12), 15  ;;  %1223 = vmatpush.bf16.msra.mxu3 %v2163_v16  ;;  %v2195_v6 = vld [vmem:[#allocation8 + $0x1e0] sm:$0xff] }
  0x23   :  { %v164_v21 = vld [vmem:[%s163_s14] sm:$0x1]  ;;  %91 = vst.msk [vmem:[#allocation2 + $0x10] sm:$0x1] %vm72_vm0, %v90_v20  ;;  %s236_s15 = scalar_lea.vmem [#allocation5], %s2661_s2  ;;  %p1572_p9 = scmp.lt.s32.totalorder %s2352_s8, 15  ;;  %1185 = vmatpush.bf16.msra.mxu0 %v2138_v17 }
  0x24   :  { %v237_v23 = vld [vmem:[%s236_s15] sm:$0x1]  ;;  %s379_s16 = scalar_select %p378_p8, %s2352_s8, 0  ;;  %165 = vst.msk [vmem:[#allocation2 + $0x11] sm:$0x1] %vm72_vm0, %v164_v21  ;;  %1198 = vmatpush.bf16.msra.mxu1 %v2146_v18  ;;  %v2170_v18 = vld [vmem:[#allocation8 + $0x118] sm:$0xff] }
  0x25   :  { %238 = vst.msk [vmem:[#allocation2 + $0x12] sm:$0x1] %vm72_vm0, %v237_v23  ;;  %s309_s17 = scalar_lea.vmem [#allocation5], %s2663_s12  ;;  %p451_p10 = scmp.gt.s32.totalorder %s2354_s9, 0  ;;  %1211 = vmatpush.bf16.msra.mxu2 %v2154_v19  ;;  %v2178_v19 = vld [vmem:[#allocation8 + $0x158] sm:$0xff]  ;;  %v2169_v23 = vld [vmem:[#allocation8 + $0x110] sm:$0xff] }
  0x26   :  { %v310_v24 = vld [vmem:[%s309_s17] sm:$0x1]  ;;  %p1620_p11 = scmp.lt.s32.totalorder %s2354_s9, 15  ;;  %s2665_s16 = smov (!%p1572_p9, %s379_s16), 15  ;;  %1224 = vmatpush.bf16.msra.mxu3 %v2162_v22  ;;  %v2186_v20 = vld [vmem:[#allocation8 + $0x198] sm:$0xff] }
  0x27   :  { %311 = vst.msk [vmem:[#allocation2 + $0x13] sm:$0x1] %vm72_vm0, %v310_v24  ;;  %s452_s18 = scalar_select %p451_p10, %s2354_s9, 0  ;;  %1186 = vmatpush.bf16.msra.mxu0 %v2137_v25  ;;  %v2194_v21 = vld [vmem:[#allocation8 + $0x1d8] sm:$0xff]  ;;  %v2177_v24 = vld [vmem:[#allocation8 + $0x150] sm:$0xff] }
  0x28   :  { %s2390_s19 = sld [smem:[#allocation4 + $0x32]]  ;;  %s382_s20 = scalar_lea.vmem [#allocation5], %s2665_s16  ;;  %1199 = vmatpush.bf16.msra.mxu1 %v2145_v26  ;;  %v2185_v25 = vld [vmem:[#allocation8 + $0x190] sm:$0xff] }
  0x29   :  { %v383_v29 = vld [vmem:[%s382_s20] sm:$0x1]  ;;  %s2667_s18 = smov (!%p1620_p11, %s452_s18), 15  ;;  %s2395_s21 = sld [smem:[#allocation4 + $0x3a]]  ;;  %1212 = vmatpush.bf16.msra.mxu2 %v2153_v27 }
  0x2a   :  { %384 = vst.msk [vmem:[#allocation2 + $0x14] sm:$0x1] %vm72_vm0, %v383_v29  ;;  %s2397_s22 = sld [smem:[#allocation4 + $0x3]]  ;;  %1225 = vmatpush.bf16.msra.mxu3 %v2161_v28  ;;  %s455_s23 = scalar_lea.vmem [#allocation5], %s2667_s18  ;;  %v2193_v26 = vld [vmem:[#allocation8 + $0x1d0] sm:$0xff]  ;;  %v2168_v28 = vld [vmem:[#allocation8 + $0x108] sm:$0xff] }
  0x2b   :  { %v456_v34 = vld [vmem:[%s455_s23] sm:$0x1]  ;;  %s2399_s24 = sld [smem:[#allocation4 + $0xb]]  ;;  %1187 = vmatpush.bf16.msra.mxu0 %v2136_v30  ;;  %v2176_v29 = vld [vmem:[#allocation8 + $0x148] sm:$0xff] }
  0x2c   :  { %457 = vst.msk [vmem:[#allocation2 + $0x15] sm:$0x1] %vm72_vm0, %v456_v34  ;;  %s2402_s25 = sld [smem:[#allocation4 + $0x13]]  ;;  %1200 = vmatpush.bf16.msra.mxu1 %v2144_v31  ;;  %v2184_v30 = vld [vmem:[#allocation8 + $0x188] sm:$0xff]  ;;  %v2175_v34 = vld [vmem:[#allocation8 + $0x140] sm:$0xff] }
  0x2d   :  { %s2406_s0 = sld [smem:[#allocation4 + $0x1b]]  ;;  %1213 = vmatpush.bf16.msra.mxu2 %v2152_v32  ;;  %v2192_v31 = vld [vmem:[#allocation8 + $0x1c8] sm:$0xff] }
  0x2e   :  { %p524_p12 = scmp.gt.s32.totalorder %s2390_s19, 0  ;;  %p1668_p13 = scmp.lt.s32.totalorder %s2390_s19, 15  ;;  %1226 = vmatpush.bf16.msra.mxu3 %v2160_v33  ;;  %v2167_v33 = vld [vmem:[#allocation8 + $0x100] sm:$0xff] }
  0x2f   :  { %p597_p0 = scmp.gt.s32.totalorder %s2395_s21, 0  ;;  %p1716_p1 = scmp.lt.s32.totalorder %s2395_s21, 15  ;;  %1188 = vmatpush.bf16.msra.mxu0 %v2135_v35  ;;  %v2183_v35 = vld [vmem:[#allocation8 + $0x180] sm:$0xff] }
  0x30   :  { %s525_s26 = scalar_select %p524_p12, %s2390_s19, 0  ;;  %1201 = vmatpush.bf16.msra.mxu1 %v2143_v36  ;;  %v2191_v36 = vld [vmem:[#allocation8 + $0x1c0] sm:$0xff] }
  0x31   :  { %s598_s27 = scalar_select %p597_p0, %s2395_s21, 0  ;;  %1214 = vmatpush.bf16.msra.mxu2 %v2151_v37 }
  0x32   :  { %s2669_s26 = smov (!%p1668_p13, %s525_s26), 15  ;;  %1227 = vmatpush.bf16.msra.mxu3 %v2159_v38  ;;  %p94_p2 = scmp.gt.s32.totalorder %s2397_s22, 0 }
  0x33   :  { %1233 = vmatpush.bf16.msrb.mxu0 %v2174_v39  ;;  %s528_s28 = scalar_lea.vmem [#allocation5], %s2669_s26  ;;  %s2671_s27 = smov (!%p1716_p1, %s598_s27), 15 }
  0x34   :  { %1246 = vmatpush.bf16.msrb.mxu1 %v2182_v40  ;;  %v529_v45 = vld [vmem:[%s528_s28] sm:$0x1]  ;;  %s95_s29 = scalar_select %p94_p2, %s2397_s22, 0 }
  0x35   :  { %1259 = vmatpush.bf16.msrb.mxu2 %v2190_v41  ;;  %530 = vst.msk [vmem:[#allocation2 + $0x16] sm:$0x1] %vm72_vm0, %v529_v45  ;;  %p1386_p3 = scmp.lt.s32.totalorder %s2397_s22, 15  ;;  %s601_s30 = scalar_lea.vmem [#allocation5], %s2671_s27 }
  0x36   :  { %1272 = vmatpush.bf16.msrb.mxu3 %v2198_v42  ;;  %v602_v48 = vld [vmem:[%s601_s30] sm:$0x1]  ;;  %p168_p4 = scmp.gt.s32.totalorder %s2399_s24, 0  ;;  %p1434_p5 = scmp.lt.s32.totalorder %s2399_s24, 15 }
  0x37   :  { %1234 = vmatpush.bf16.msrb.mxu0 %v2173_v43  ;;  %603 = vst.msk [vmem:[#allocation2 + $0x17] sm:$0x1] %vm72_vm0, %v602_v48  ;;  %s2673_s29 = smov (!%p1386_p3, %s95_s29), 15  ;;  %p241_p6 = scmp.gt.s32.totalorder %s2402_s25, 0 }
  0x38   :  { %1247 = vmatpush.bf16.msrb.mxu1 %v2181_v44  ;;  %s2675_s24 = smov (!%p168_p4, %s2399_s24), 0  ;;  %s98_s5 = scalar_lea.vmem [#allocation5], %s2673_s29 }
  0x39   :  { %1260 = vmatpush.bf16.msrb.mxu2 %v2189_v46  ;;  %v99_v49 = vld [vmem:[%s98_s5] sm:$0x1]  ;;  %s2677_s24 = smov (!%p1434_p5, %s2675_s24), 15  ;;  %p1482_p7 = scmp.lt.s32.totalorder %s2402_s25, 15 }
  0x3a   :  { %1273 = vmatpush.bf16.msrb.mxu3 %v2197_v47  ;;  %100 = vst.msk [vmem:[#allocation2 + $0x18] sm:$0x1] %vm72_vm0, %v99_v49  ;;  %s242_s1 = scalar_select %p241_p6, %s2402_s25, 0 }
  0x3b   :  { %s172_s6 = scalar_lea.vmem [#allocation5], %s2677_s24  ;;  %p314_p8 = scmp.gt.s32.totalorder %s2406_s0, 0  ;;  %1235 = vmatpush.bf16.msrb.mxu0 %v2172_v54 }
  0x3c   :  { %v173_v50 = vld [vmem:[%s172_s6] sm:$0x1]  ;;  %p1530_p9 = scmp.lt.s32.totalorder %s2406_s0, 15  ;;  %s2679_s1 = smov (!%p1482_p7, %s242_s1), 15  ;;  %1248 = vmatpush.bf16.msrb.mxu1 %v2180_v55 }
  0x3d   :  { %174 = vst.msk [vmem:[#allocation2 + $0x19] sm:$0x1] %vm72_vm0, %v173_v50  ;;  %s2681_s0 = smov (!%p314_p8, %s2406_s0), 0  ;;  %s1577_s2 = sld [smem:[#allocation4 + $0x23]]  ;;  %1261 = vmatpush.bf16.msrb.mxu2 %v2188_v56 }
  0x3e   :  { %v651_v51 = vld [vmem:[#allocation2 + $0x10] sm:$0xff]  ;;  %s245_s7 = scalar_lea.vmem [#allocation5], %s2679_s1  ;;  %s2683_s0 = smov (!%p1530_p9, %s2681_s0), 15  ;;  %1274 = vmatpush.bf16.msrb.mxu3 %v2196_v57 }
  0x3f   :  { %v659_v52 = vpack.c.bf16 %v651_v51, %v651_v51  ;;  %v246_v53 = vld [vmem:[%s245_s7] sm:$0x1]  ;;  %s1625_s8 = sld [smem:[#allocation4 + $0x2b]]  ;;  %s318_s10 = scalar_lea.vmem [#allocation5], %s2683_s0  ;;  %1236 = vmatpush.bf16.msrb.mxu0 %v2171_v3 }
  0x40   :  { %247 = vst.msk [vmem:[#allocation2 + $0x1a] sm:$0x1] %vm72_vm0, %v246_v53  ;;  %s2433_s9 = sld [smem:[#allocation4 + $0x33]]  ;;  %v319_v58 = vld [vmem:[%s318_s10] sm:$0x1]  ;;  %1249 = vmatpush.bf16.msrb.mxu1 %v2179_v4 }
  0x41   :  { %1215 = vmatmul.bf16.vlgmr.msra.gmra.mxu2 %v659_v52  ;;  %s2435_s11 = sld [smem:[#allocation4 + $0x3b]]  ;;  %320 = vst.msk [vmem:[#allocation2 + $0x1b] sm:$0x1] %vm72_vm0, %v319_v58 }
  0x42   :  { %s2438_s12 = sld [smem:[#allocation4]]  ;;  %1262 = vmatpush.bf16.msrb.mxu2 %v2187_v5  ;;  %1275 = vmatpush.bf16.msrb.mxu3 %v2195_v6 }
  0x43   :  { %p387_p10 = scmp.gt.s32.totalorder %s1577_s2, 0  ;;  %p1578_p11 = scmp.lt.s32.totalorder %s1577_s2, 15  ;;  %1237 = vmatpush.bf16.msrb.mxu0 %v2170_v18  ;;  %v2208_v18 = vld [vmem:[%s2652_s3] ss:$0 sm:$0xff] }
  0x44   :  { %s2440_s13 = sld [smem:[#allocation4 + $0x8]]  ;;  %1250 = vmatpush.bf16.msrb.mxu1 %v2178_v19  ;;  %s2309_s3 = smov [#allocation10]  }
  0x45   :  { %s2685_s2 = smov (!%p387_p10, %s1577_s2), 0  ;;  %p460_p12 = scmp.gt.s32.totalorder %s1625_s8, 0 }
  0x46   :  { %p1626_p13 = scmp.lt.s32.totalorder %s1625_s8, 15  ;;  %s2687_s2 = smov (!%p1578_p11, %s2685_s2), 15  ;;  %1263 = vmatpush.bf16.msrb.mxu2 %v2186_v20  ;;  %1276 = vmatpush.bf16.msrb.mxu3 %v2194_v21 }
  0x47   :  { %s2689_s8 = smov (!%p460_p12, %s1625_s8), 0  ;;  %p533_p0 = scmp.gt.s32.totalorder %s2433_s9, 0  ;;  %1238 = vmatpush.bf16.msrb.mxu0 %v2169_v23 }
  0x48   :  { %s391_s14 = scalar_lea.vmem [#allocation5], %s2687_s2  ;;  %s2691_s8 = smov (!%p1626_p13, %s2689_s8), 15  ;;  %1251 = vmatpush.bf16.msrb.mxu1 %v2177_v24 }
  0x49   :  { %v392_v59 = vld [vmem:[%s391_s14] sm:$0x1]  ;;  %s534_s15 = scalar_select %p533_p0, %s2433_s9, 0 }
  0x4a   :  { %393 = vst.msk [vmem:[#allocation2 + $0x1c] sm:$0x1] %vm72_vm0, %v392_v59  ;;  %p1674_p1 = scmp.lt.s32.totalorder %s2433_s9, 15  ;;  %s464_s16 = scalar_lea.vmem [#allocation5], %s2691_s8  ;;  %1264 = vmatpush.bf16.msrb.mxu2 %v2185_v25  ;;  %1277 = vmatpush.bf16.msrb.mxu3 %v2193_v26 }
  0x4b   :  { %v465_v60 = vld [vmem:[%s464_s16] sm:$0x1]  ;;  %p606_p2 = scmp.gt.s32.totalorder %s2435_s11, 0  ;;  %p1722_p3 = scmp.lt.s32.totalorder %s2435_s11, 15  ;;  %1239 = vmatpush.bf16.msrb.mxu0 %v2168_v28 }
  0x4c   :  { %466 = vst.msk [vmem:[#allocation2 + $0x1d] sm:$0x1] %vm72_vm0, %v465_v60  ;;  %s2693_s15 = smov (!%p1674_p1, %s534_s15), 15  ;;  %p66_p4 = scmp.gt.s32.totalorder %s2438_s12, 0  ;;  %1252 = vmatpush.bf16.msrb.mxu1 %v2176_v29 }
  0x4d   :  { %s2695_s11 = smov (!%p606_p2, %s2435_s11), 0  ;;  %s537_s17 = scalar_lea.vmem [#allocation5], %s2693_s15 }
  0x4e   :  { %v538_v61 = vld [vmem:[%s537_s17] sm:$0x1]  ;;  %s2697_s11 = smov (!%p1722_p3, %s2695_s11), 15  ;;  %p1368_p5 = scmp.lt.s32.totalorder %s2438_s12, 15  ;;  %1265 = vmatpush.bf16.msrb.mxu2 %v2184_v30  ;;  %1278 = vmatpush.bf16.msrb.mxu3 %v2192_v31 }
  0x4f   :  { %539 = vst.msk [vmem:[#allocation2 + $0x1e] sm:$0x1] %vm72_vm0, %v538_v61  ;;  %s67_s18 = scalar_select %p66_p4, %s2438_s12, 0  ;;  %1240 = vmatpush.bf16.msrb.mxu0 %v2167_v33 }
  0x50   :  { %s610_s19 = scalar_lea.vmem [#allocation5], %s2697_s11  ;;  %p141_p6 = scmp.gt.s32.totalorder %s2440_s13, 0  ;;  %1253 = vmatpush.bf16.msrb.mxu1 %v2175_v34 }
  0x51   :  { %v611_v62 = vld [vmem:[%s610_s19] sm:$0x1]  ;;  %p1416_p7 = scmp.lt.s32.totalorder %s2440_s13, 15  ;;  %s2699_s18 = smov (!%p1368_p5, %s67_s18), 15 }
  0x52   :  { %612 = vst.msk [vmem:[#allocation2 + $0x1f] sm:$0x1] %vm72_vm0, %v611_v62  ;;  %s2701_s13 = smov (!%p141_p6, %s2440_s13), 0  ;;  %s1463_s20 = sld [smem:[#allocation4 + $0x10]]  ;;  %1266 = vmatpush.bf16.msrb.mxu2 %v2183_v35  ;;  %1279 = vmatpush.bf16.msrb.mxu3 %v2191_v36 }
  0x53   :  { %s70_s21 = scalar_lea.vmem [#allocation5], %s2699_s18  ;;  %s2703_s13 = smov (!%p1416_p7, %s2701_s13), 15 }
  0x54   :  { %v71_v63 = vld [vmem:[%s70_s21] sm:$0x1]  ;;  %s2459_s22 = sld [smem:[#allocation4 + $0x18]]  ;;  %s145_s24 = scalar_lea.vmem [#allocation5], %s2703_s13 }
  0x55   :  { %73 = vst.msk [vmem:[#allocation2] sm:$0x1] %vm72_vm0, %v71_v63  ;;  %s2461_s23 = sld [smem:[#allocation4 + $0x20]]  ;;  %v146_v0 = vld [vmem:[%s145_s24] sm:$0x1] }
  0x56   :  { %s2463_s25 = sld [smem:[#allocation4 + $0x28]]  ;;  %147 = vst.msk [vmem:[#allocation2 + $0x1] sm:$0x1] %vm72_vm0, %v146_v0 }
  0x57   :  { %s2466_s0 = sld [smem:[#allocation4 + $0x30]] }
  0x58   :  { %p214_p8 = scmp.gt.s32.totalorder %s1463_s20, 0  ;;  %p1464_p9 = scmp.lt.s32.totalorder %s1463_s20, 15 }
  0x59   :  { %v652_v1 = vld [vmem:[#allocation2 + $0x18] sm:$0xff]  ;;  %s2468_s26 = sld [smem:[#allocation4 + $0x38]] }
  0x5a   :  { %v660_v2 = vpack.c.bf16 %v652_v1, %v652_v1  ;;  %s2705_s20 = smov (!%p214_p8, %s1463_s20), 0  ;;  %p287_p10 = scmp.gt.s32.totalorder %s2459_s22, 0 }
  0x5b   :  { %p1512_p11 = scmp.lt.s32.totalorder %s2459_s22, 15  ;;  %s2707_s20 = smov (!%p1464_p9, %s2705_s20), 15 }
  0x5c   :  { %1228 = vmatmul.bf16.vlgmr.msra.gmra.mxu3 %v660_v2  ;;  %s2709_s22 = smov (!%p287_p10, %s2459_s22), 0  ;;  %p360_p12 = scmp.gt.s32.totalorder %s2461_s23, 0 }
  0x5d   :  { %s218_s27 = scalar_lea.vmem [#allocation5], %s2707_s20  ;;  %s2711_s22 = smov (!%p1512_p11, %s2709_s22), 15 }
  0x5e   :  { %v219_v7 = vld [vmem:[%s218_s27] sm:$0x1]  ;;  %s361_s28 = scalar_select %p360_p12, %s2461_s23, 0 }
  0x5f   :  { %220 = vst.msk [vmem:[#allocation2 + $0x2] sm:$0x1] %vm72_vm0, %v219_v7  ;;  %p1560_p13 = scmp.lt.s32.totalorder %s2461_s23, 15  ;;  %s291_s29 = scalar_lea.vmem [#allocation5], %s2711_s22 }
  0x60   :  { %v292_v8 = vld [vmem:[%s291_s29] sm:$0x1]  ;;  %p433_p0 = scmp.gt.s32.totalorder %s2463_s25, 0  ;;  %p1608_p1 = scmp.lt.s32.totalorder %s2463_s25, 15 }
  0x61   :  { %293 = vst.msk [vmem:[#allocation2 + $0x3] sm:$0x1] %vm72_vm0, %v292_v8  ;;  %s2713_s28 = smov (!%p1560_p13, %s361_s28), 15  ;;  %p506_p2 = scmp.gt.s32.totalorder %s2466_s0, 0 }
  0x62   :  { %s2715_s25 = smov (!%p433_p0, %s2463_s25), 0  ;;  %s364_s30 = scalar_lea.vmem [#allocation5], %s2713_s28 }
  0x63   :  { %v365_v9 = vld [vmem:[%s364_s30] sm:$0x1]  ;;  %s2717_s25 = smov (!%p1608_p1, %s2715_s25), 15  ;;  %p1656_p3 = scmp.lt.s32.totalorder %s2466_s0, 15 }
  0x64   :  { %366 = vst.msk [vmem:[#allocation2 + $0x4] sm:$0x1] %vm72_vm0, %v365_v9  ;;  %s507_s5 = scalar_select %p506_p2, %s2466_s0, 0 }
  0x65   :  { %s437_s1 = scalar_lea.vmem [#allocation5], %s2717_s25  ;;  %p579_p4 = scmp.gt.s32.totalorder %s2468_s26, 0 }
  0x66   :  { %v438_v10 = vld [vmem:[%s437_s1] sm:$0x1]  ;;  %p1704_p5 = scmp.lt.s32.totalorder %s2468_s26, 15  ;;  %s2719_s5 = smov (!%p1656_p3, %s507_s5), 15 }
  0x67   :  { %439 = vst.msk [vmem:[#allocation2 + $0x5] sm:$0x1] %vm72_vm0, %v438_v10  ;;  %s2721_s26 = smov (!%p579_p4, %s2468_s26), 0  ;;  %s1373_s6 = sld [smem:[#allocation4 + $0x1]] }
  0x68   :  { %s510_s2 = scalar_lea.vmem [#allocation5], %s2719_s5  ;;  %s2723_s26 = smov (!%p1704_p5, %s2721_s26), 15 }
  0x69   :  { %v511_v11 = vld [vmem:[%s510_s2] sm:$0x1]  ;;  %s1421_s7 = sld [smem:[#allocation4 + $0x9]]  ;;  %s583_s9 = scalar_lea.vmem [#allocation5], %s2723_s26 }
  0x6a   :  { %512 = vst.msk [vmem:[#allocation2 + $0x6] sm:$0x1] %vm72_vm0, %v511_v11  ;;  %s2490_s8 = sld [smem:[#allocation4 + $0x11]]  ;;  %v584_v12 = vld [vmem:[%s583_s9] sm:$0x1] }
  0x6b   :  { %s2492_s10 = sld [smem:[#allocation4 + $0x19]]  ;;  %585 = vst.msk [vmem:[#allocation2 + $0x7] sm:$0x1] %vm72_vm0, %v584_v12 }
  0x6c   :  { %s2495_s11 = sld [smem:[#allocation4 + $0x21]] }
  0x6d   :  { %p76_p6 = scmp.gt.s32.totalorder %s1373_s6, 0  ;;  %p1374_p7 = scmp.lt.s32.totalorder %s1373_s6, 15 }
  0x6e   :  { %s2497_s12 = sld [smem:[#allocation4 + $0x29]] }
  0x6f   :  { %s2725_s6 = smov (!%p76_p6, %s1373_s6), 0  ;;  %p150_p8 = scmp.gt.s32.totalorder %s1421_s7, 0 }
  0x70   :  { %p1422_p9 = scmp.lt.s32.totalorder %s1421_s7, 15  ;;  %s2727_s6 = smov (!%p1374_p7, %s2725_s6), 15 }
  0x71   :  { %s2729_s7 = smov (!%p150_p8, %s1421_s7), 0  ;;  %p223_p10 = scmp.gt.s32.totalorder %s2490_s8, 0 }
  0x72   :  { %v649_v13 = vld [vmem:[#allocation2] sm:$0xff]  ;;  %s80_s13 = scalar_lea.vmem [#allocation5], %s2727_s6  ;;  %s2731_s7 = smov (!%p1422_p9, %s2729_s7), 15 }
  0x73   :  { %v657_v14 = vpack.c.bf16 %v649_v13, %v649_v13  ;;  %v81_v15 = vld [vmem:[%s80_s13] sm:$0x1]  ;;  %s224_s14 = scalar_select %p223_p10, %s2490_s8, 0 }
  0x74   :  { %82 = vst.msk [vmem:[#allocation2 + $0x8] sm:$0x1] %vm72_vm0, %v81_v15  ;;  %p1470_p11 = scmp.lt.s32.totalorder %s2490_s8, 15  ;;  %s154_s15 = scalar_lea.vmem [#allocation5], %s2731_s7 }
  0x75   :  { %1189 = vmatmul.bf16.vlgmr.msra.gmra.mxu0 %v657_v14  ;;  %v155_v16 = vld [vmem:[%s154_s15] sm:$0x1]  ;;  %p296_p12 = scmp.gt.s32.totalorder %s2492_s10, 0  ;;  %p1518_p13 = scmp.lt.s32.totalorder %s2492_s10, 15 }
  0x76   :  { %156 = vst.msk [vmem:[#allocation2 + $0x9] sm:$0x1] %vm72_vm0, %v155_v16  ;;  %s2733_s14 = smov (!%p1470_p11, %s224_s14), 15  ;;  %p369_p0 = scmp.gt.s32.totalorder %s2495_s11, 0 }
  0x77   :  { %s2735_s10 = smov (!%p296_p12, %s2492_s10), 0  ;;  %s227_s16 = scalar_lea.vmem [#allocation5], %s2733_s14 }
  0x78   :  { %v228_v17 = vld [vmem:[%s227_s16] sm:$0x1]  ;;  %s2737_s10 = smov (!%p1518_p13, %s2735_s10), 15  ;;  %p1566_p1 = scmp.lt.s32.totalorder %s2495_s11, 15 }
  0x79   :  { %229 = vst.msk [vmem:[#allocation2 + $0xa] sm:$0x1] %vm72_vm0, %v228_v17  ;;  %s370_s17 = scalar_select %p369_p0, %s2495_s11, 0 }
  0x7a   :  { %s300_s18 = scalar_lea.vmem [#allocation5], %s2737_s10  ;;  %p442_p2 = scmp.gt.s32.totalorder %s2497_s12, 0 }
  0x7b   :  { %v301_v22 = vld [vmem:[%s300_s18] sm:$0x1]  ;;  %p1614_p3 = scmp.lt.s32.totalorder %s2497_s12, 15  ;;  %s2739_s17 = smov (!%p1566_p1, %s370_s17), 15 }
  0x7c   :  { %302 = vst.msk [vmem:[#allocation2 + $0xb] sm:$0x1] %vm72_vm0, %v301_v22  ;;  %s443_s19 = scalar_select %p442_p2, %s2497_s12, 0 }
  0x7d   :  { %s2515_s20 = sld [smem:[#allocation4 + $0x31]]  ;;  %s373_s21 = scalar_lea.vmem [#allocation5], %s2739_s17 }
  0x7e   :  { %v374_v27 = vld [vmem:[%s373_s21] sm:$0x1]  ;;  %s2741_s19 = smov (!%p1614_p3, %s443_s19), 15  ;;  %s2520_s22 = sld [smem:[#allocation4 + $0x39]] }
  0x7f   :  { %375 = vst.msk [vmem:[#allocation2 + $0xc] sm:$0x1] %vm72_vm0, %v374_v27  ;;  %s2522_s23 = sld [smem:[#allocation4 + $0x4]]  ;;  %s446_s24 = scalar_lea.vmem [#allocation5], %s2741_s19 }
  0x80   :  { %v447_v32 = vld [vmem:[%s446_s24] sm:$0x1]  ;;  %s2524_s25 = sld [smem:[#allocation4 + $0xc]] }
  0x81   :  { %448 = vst.msk [vmem:[#allocation2 + $0xd] sm:$0x1] %vm72_vm0, %v447_v32  ;;  %s2527_s0 = sld [smem:[#allocation4 + $0x14]] }
  0x82   :  { %s2531_s26 = sld [smem:[#allocation4 + $0x1c]] }
  0x83   :  { %p515_p4 = scmp.gt.s32.totalorder %s2515_s20, 0  ;;  %p1662_p5 = scmp.lt.s32.totalorder %s2515_s20, 15 }
  0x84   :  { %p588_p6 = scmp.gt.s32.totalorder %s2520_s22, 0  ;;  %p1710_p7 = scmp.lt.s32.totalorder %s2520_s22, 15 }
  0x85   :  { %s2743_s20 = smov (!%p515_p4, %s2515_s20), 0  ;;  %p103_p8 = scmp.gt.s32.totalorder %s2522_s23, 0 }
  0x86   :  { %s2745_s20 = smov (!%p1662_p5, %s2743_s20), 15  ;;  %s2747_s22 = smov (!%p588_p6, %s2520_s22), 0 }
  0x87   :  { %s519_s27 = scalar_lea.vmem [#allocation5], %s2745_s20  ;;  %s2749_s22 = smov (!%p1710_p7, %s2747_s22), 15 }
  0x88   :  { %v520_v37 = vld [vmem:[%s519_s27] sm:$0x1]  ;;  %s104_s28 = scalar_select %p103_p8, %s2522_s23, 0 }
  0x89   :  { %521 = vst.msk [vmem:[#allocation2 + $0xe] sm:$0x1] %vm72_vm0, %v520_v37  ;;  %p1392_p9 = scmp.lt.s32.totalorder %s2522_s23, 15  ;;  %s592_s29 = scalar_lea.vmem [#allocation5], %s2749_s22 }
  0x8a   :  { %v593_v38 = vld [vmem:[%s592_s29] sm:$0x1]  ;;  %p177_p10 = scmp.gt.s32.totalorder %s2524_s25, 0  ;;  %p1440_p11 = scmp.lt.s32.totalorder %s2524_s25, 15 }
  0x8b   :  { %594 = vst.msk [vmem:[#allocation2 + $0xf] sm:$0x1] %vm72_vm0, %v593_v38  ;;  %s2751_s28 = smov (!%p1392_p9, %s104_s28), 15  ;;  %p250_p12 = scmp.gt.s32.totalorder %s2527_s0, 0 }
  0x8c   :  { %s2753_s25 = smov (!%p177_p10, %s2524_s25), 0  ;;  %s107_s30 = scalar_lea.vmem [#allocation5], %s2751_s28 }
  0x8d   :  { %v108_v39 = vld [vmem:[%s107_s30] sm:$0x1]  ;;  %s2755_s25 = smov (!%p1440_p11, %s2753_s25), 15  ;;  %p1488_p13 = scmp.lt.s32.totalorder %s2527_s0, 15 }
  0x8e   :  { %109 = vst.msk [vmem:[#allocation2 + $0x20] sm:$0x1] %vm72_vm0, %v108_v39  ;;  %s251_s5 = scalar_select %p250_p12, %s2527_s0, 0 }
  0x8f   :  { %s181_s1 = scalar_lea.vmem [#allocation5], %s2755_s25  ;;  %p323_p0 = scmp.gt.s32.totalorder %s2531_s26, 0 }
  0x90   :  { %v182_v40 = vld [vmem:[%s181_s1] sm:$0x1]  ;;  %p1536_p1 = scmp.lt.s32.totalorder %s2531_s26, 15  ;;  %s2757_s5 = smov (!%p1488_p13, %s251_s5), 15 }
  0x91   :  { %183 = vst.msk [vmem:[#allocation2 + $0x21] sm:$0x1] %vm72_vm0, %v182_v40  ;;  %s2759_s26 = smov (!%p323_p0, %s2531_s26), 0  ;;  %s1583_s6 = sld [smem:[#allocation4 + $0x24]] }
  0x92   :  { %v650_v41 = vld [vmem:[#allocation2 + $0x8] sm:$0xff]  ;;  %s254_s2 = scalar_lea.vmem [#allocation5], %s2757_s5  ;;  %s2761_s26 = smov (!%p1536_p1, %s2759_s26), 15 }
  0x93   :  { %v658_v42 = vpack.c.bf16 %v650_v41, %v650_v41  ;;  %v255_v43 = vld [vmem:[%s254_s2] sm:$0x1]  ;;  %s1631_s7 = sld [smem:[#allocation4 + $0x2c]]  ;;  %s327_s9 = scalar_lea.vmem [#allocation5], %s2761_s26 }
  0x94   :  { %256 = vst.msk [vmem:[#allocation2 + $0x22] sm:$0x1] %vm72_vm0, %v255_v43  ;;  %s1679_s8 = sld [smem:[#allocation4 + $0x34]]  ;;  %v328_v44 = vld [vmem:[%s327_s9] sm:$0x1] }
  0x95   :  { %1202 = vmatmul.bf16.vlgmr.msra.gmra.mxu1 %v658_v42  ;;  %s1727_s10 = sld [smem:[#allocation4 + $0x3c]]  ;;  %329 = vst.msk [vmem:[#allocation2 + $0x23] sm:$0x1] %vm72_vm0, %v328_v44 }
  0x96   :  { %s2555_s11 = sld [smem:[#allocation4 + $0x5]] }
  0x97   :  { %p396_p2 = scmp.gt.s32.totalorder %s1583_s6, 0  ;;  %p1584_p3 = scmp.lt.s32.totalorder %s1583_s6, 15 }
  0x98   :  { %s2557_s12 = sld [smem:[#allocation4 + $0xd]] }
  0x99   :  { %s2763_s6 = smov (!%p396_p2, %s1583_s6), 0  ;;  %p469_p4 = scmp.gt.s32.totalorder %s1631_s7, 0 }
  0x9a   :  { %p1632_p5 = scmp.lt.s32.totalorder %s1631_s7, 15  ;;  %s2765_s6 = smov (!%p1584_p3, %s2763_s6), 15 }
  0x9b   :  { %s2767_s7 = smov (!%p469_p4, %s1631_s7), 0  ;;  %p542_p6 = scmp.gt.s32.totalorder %s1679_s8, 0 }
  0x9c   :  { %s400_s13 = scalar_lea.vmem [#allocation5], %s2765_s6  ;;  %s2769_s7 = smov (!%p1632_p5, %s2767_s7), 15 }
  0x9d   :  { %v401_v45 = vld [vmem:[%s400_s13] sm:$0x1]  ;;  %s543_s14 = scalar_select %p542_p6, %s1679_s8, 0 }
  0x9e   :  { %402 = vst.msk [vmem:[#allocation2 + $0x24] sm:$0x1] %vm72_vm0, %v401_v45  ;;  %p1680_p7 = scmp.lt.s32.totalorder %s1679_s8, 15  ;;  %s473_s15 = scalar_lea.vmem [#allocation5], %s2769_s7 }
  0x9f   :  { %v474_v46 = vld [vmem:[%s473_s15] sm:$0x1]  ;;  %p615_p8 = scmp.gt.s32.totalorder %s1727_s10, 0  ;;  %p1728_p9 = scmp.lt.s32.totalorder %s1727_s10, 15 }
  0xa0   :  { %475 = vst.msk [vmem:[#allocation2 + $0x25] sm:$0x1] %vm72_vm0, %v474_v46  ;;  %s2771_s14 = smov (!%p1680_p7, %s543_s14), 15  ;;  %p112_p10 = scmp.gt.s32.totalorder %s2555_s11, 0 }
  0xa1   :  { %s2773_s10 = smov (!%p615_p8, %s1727_s10), 0  ;;  %s546_s16 = scalar_lea.vmem [#allocation5], %s2771_s14 }
  0xa2   :  { %v547_v47 = vld [vmem:[%s546_s16] sm:$0x1]  ;;  %s2775_s10 = smov (!%p1728_p9, %s2773_s10), 15  ;;  %p1398_p11 = scmp.lt.s32.totalorder %s2555_s11, 15 }
  0xa3   :  { %548 = vst.msk [vmem:[#allocation2 + $0x26] sm:$0x1] %vm72_vm0, %v547_v47  ;;  %s113_s17 = scalar_select %p112_p10, %s2555_s11, 0 }
  0xa4   :  { %s619_s18 = scalar_lea.vmem [#allocation5], %s2775_s10  ;;  %p186_p12 = scmp.gt.s32.totalorder %s2557_s12, 0 }
  0xa5   :  { %v620_v48 = vld [vmem:[%s619_s18] sm:$0x1]  ;;  %p1446_p13 = scmp.lt.s32.totalorder %s2557_s12, 15  ;;  %s2777_s17 = smov (!%p1398_p11, %s113_s17), 15 }
  0xa6   :  { %621 = vst.msk [vmem:[#allocation2 + $0x27] sm:$0x1] %vm72_vm0, %v620_v48  ;;  %s2779_s12 = smov (!%p186_p12, %s2557_s12), 0  ;;  %s1493_s19 = sld [smem:[#allocation4 + $0x15]] }
  0xa7   :  { %s116_s20 = scalar_lea.vmem [#allocation5], %s2777_s17  ;;  %s2781_s12 = smov (!%p1446_p13, %s2779_s12), 15 }
  0xa8   :  { %v117_v49 = vld [vmem:[%s116_s20] sm:$0x1]  ;;  %s1541_s21 = sld [smem:[#allocation4 + $0x1d]]  ;;  %s190_s23 = scalar_lea.vmem [#allocation5], %s2781_s12 }
  0xa9   :  { %118 = vst.msk [vmem:[#allocation2 + $0x28] sm:$0x1] %vm72_vm0, %v117_v49  ;;  %s2570_s22 = sld [smem:[#allocation4 + $0x25]]  ;;  %v191_v50 = vld [vmem:[%s190_s23] sm:$0x1] }
  0xaa   :  { %s2572_s24 = sld [smem:[#allocation4 + $0x2d]]  ;;  %192 = vst.msk [vmem:[#allocation2 + $0x29] sm:$0x1] %vm72_vm0, %v191_v50 }
  0xab   :  { %s2575_s25 = sld [smem:[#allocation4 + $0x35]] }
  0xac   :  { %p259_p0 = scmp.gt.s32.totalorder %s1493_s19, 0  ;;  %p1494_p1 = scmp.lt.s32.totalorder %s1493_s19, 15 }
  0xad   :  { %v653_v51 = vld [vmem:[#allocation2 + $0x20] sm:$0xff]  ;;  %s2577_s0 = sld [smem:[#allocation4 + $0x3d]] }
  0xae   :  { %v661_v52 = vpack.c.bf16 %v653_v51, %v653_v51  ;;  %s2783_s19 = smov (!%p259_p0, %s1493_s19), 0  ;;  %p332_p2 = scmp.gt.s32.totalorder %s1541_s21, 0 }
  0xaf   :  { %p1542_p3 = scmp.lt.s32.totalorder %s1541_s21, 15  ;;  %s2785_s19 = smov (!%p1494_p1, %s2783_s19), 15 }
  0xb0   :  { %1241 = vmatmul.bf16.vlgmr.msrb.gmra.mxu0 %v661_v52  ;;  %s2787_s21 = smov (!%p332_p2, %s1541_s21), 0  ;;  %p405_p4 = scmp.gt.s32.totalorder %s2570_s22, 0 }
  0xb1   :  { %s263_s26 = scalar_lea.vmem [#allocation5], %s2785_s19  ;;  %s2789_s21 = smov (!%p1542_p3, %s2787_s21), 15 }
  0xb2   :  { %v264_v53 = vld [vmem:[%s263_s26] sm:$0x1]  ;;  %s406_s27 = scalar_select %p405_p4, %s2570_s22, 0 }
  0xb3   :  { %265 = vst.msk [vmem:[#allocation2 + $0x2a] sm:$0x1] %vm72_vm0, %v264_v53  ;;  %p1590_p5 = scmp.lt.s32.totalorder %s2570_s22, 15  ;;  %s336_s28 = scalar_lea.vmem [#allocation5], %s2789_s21 }
  0xb4   :  { %v337_v54 = vld [vmem:[%s336_s28] sm:$0x1]  ;;  %p478_p6 = scmp.gt.s32.totalorder %s2572_s24, 0  ;;  %p1638_p7 = scmp.lt.s32.totalorder %s2572_s24, 15 }
  0xb5   :  { %338 = vst.msk [vmem:[#allocation2 + $0x2b] sm:$0x1] %vm72_vm0, %v337_v54  ;;  %s2791_s27 = smov (!%p1590_p5, %s406_s27), 15  ;;  %p551_p8 = scmp.gt.s32.totalorder %s2575_s25, 0 }
  0xb6   :  { %s2793_s24 = smov (!%p478_p6, %s2572_s24), 0  ;;  %s409_s29 = scalar_lea.vmem [#allocation5], %s2791_s27 }
  0xb7   :  { %v410_v55 = vld [vmem:[%s409_s29] sm:$0x1]  ;;  %s2795_s24 = smov (!%p1638_p7, %s2793_s24), 15  ;;  %p1686_p9 = scmp.lt.s32.totalorder %s2575_s25, 15 }
  0xb8   :  { %411 = vst.msk [vmem:[#allocation2 + $0x2c] sm:$0x1] %vm72_vm0, %v410_v55  ;;  %s552_s30 = scalar_select %p551_p8, %s2575_s25, 0 }
  0xb9   :  { %s482_s5 = scalar_lea.vmem [#allocation5], %s2795_s24  ;;  %p624_p10 = scmp.gt.s32.totalorder %s2577_s0, 0 }
  0xba   :  { %v483_v56 = vld [vmem:[%s482_s5] sm:$0x1]  ;;  %p1734_p11 = scmp.lt.s32.totalorder %s2577_s0, 15  ;;  %s2797_s30 = smov (!%p1686_p9, %s552_s30), 15 }
  0xbb   :  { %484 = vst.msk [vmem:[#allocation2 + $0x2d] sm:$0x1] %vm72_vm0, %v483_v56  ;;  %s2799_s0 = smov (!%p624_p10, %s2577_s0), 0  ;;  %s1403_s1 = sld [smem:[#allocation4 + $0x6]] }
  0xbc   :  { %s555_s6 = scalar_lea.vmem [#allocation5], %s2797_s30  ;;  %s2801_s0 = smov (!%p1734_p11, %s2799_s0), 15 }
  0xbd   :  { %v556_v57 = vld [vmem:[%s555_s6] sm:$0x1]  ;;  %s1451_s2 = sld [smem:[#allocation4 + $0xe]]  ;;  %s628_s8 = scalar_lea.vmem [#allocation5], %s2801_s0 }
  0xbe   :  { %557 = vst.msk [vmem:[#allocation2 + $0x2e] sm:$0x1] %vm72_vm0, %v556_v57  ;;  %s2596_s7 = sld [smem:[#allocation4 + $0x16]]  ;;  %v629_v58 = vld [vmem:[%s628_s8] sm:$0x1] }
  0xbf   :  { %s2598_s9 = sld [smem:[#allocation4 + $0x1e]]  ;;  %630 = vst.msk [vmem:[#allocation2 + $0x2f] sm:$0x1] %vm72_vm0, %v629_v58 }
  0xc0   :  { %s2601_s10 = sld [smem:[#allocation4 + $0x26]] }
  0xc1   :  { %p121_p12 = scmp.gt.s32.totalorder %s1403_s1, 0  ;;  %p1404_p13 = scmp.lt.s32.totalorder %s1403_s1, 15 }
  0xc2   :  { %s2603_s11 = sld [smem:[#allocation4 + $0x2e]] }
  0xc3   :  { %s2803_s1 = smov (!%p121_p12, %s1403_s1), 0  ;;  %p195_p0 = scmp.gt.s32.totalorder %s1451_s2, 0 }
  0xc4   :  { %p1452_p1 = scmp.lt.s32.totalorder %s1451_s2, 15  ;;  %s2805_s1 = smov (!%p1404_p13, %s2803_s1), 15  ;;  %v1216_v11 = vpop.f32.mrf.mxu2 }
  0xc5   :  { %s2807_s2 = smov (!%p195_p0, %s1451_s2), 0  ;;  %p268_p2 = scmp.gt.s32.totalorder %s2596_s7, 0 }
  0xc6   :  { %v654_v59 = vld [vmem:[#allocation2 + $0x28] sm:$0xff]  ;;  %s125_s12 = scalar_lea.vmem [#allocation5], %s2805_s1  ;;  %s2809_s2 = smov (!%p1452_p1, %s2807_s2), 15 }
  0xc7   :  { %v662_v60 = vpack.c.bf16 %v654_v59, %v654_v59  ;;  %v126_v61 = vld [vmem:[%s125_s12] sm:$0x1]  ;;  %s269_s13 = scalar_select %p268_p2, %s2596_s7, 0 }
  0xc8   :  { %127 = vst.msk [vmem:[#allocation2 + $0x30] sm:$0x1] %vm72_vm0, %v126_v61  ;;  %p1500_p3 = scmp.lt.s32.totalorder %s2596_s7, 15  ;;  %s199_s14 = scalar_lea.vmem [#allocation5], %s2809_s2 }
  0xc9   :  { %1254 = vmatmul.bf16.vlgmr.msrb.gmra.mxu1 %v662_v60  ;;  %v200_v62 = vld [vmem:[%s199_s14] sm:$0x1]  ;;  %p341_p4 = scmp.gt.s32.totalorder %s2598_s9, 0  ;;  %p1548_p5 = scmp.lt.s32.totalorder %s2598_s9, 15 }
  0xca   :  { %201 = vst.msk [vmem:[#allocation2 + $0x31] sm:$0x1] %vm72_vm0, %v200_v62  ;;  %s2811_s13 = smov (!%p1500_p3, %s269_s13), 15  ;;  %p414_p6 = scmp.gt.s32.totalorder %s2601_s10, 0 }
  0xcb   :  { %s2813_s9 = smov (!%p341_p4, %s2598_s9), 0  ;;  %s272_s15 = scalar_lea.vmem [#allocation5], %s2811_s13 }
  0xcc   :  { %v273_v63 = vld [vmem:[%s272_s15] sm:$0x1]  ;;  %s2815_s9 = smov (!%p1548_p5, %s2813_s9), 15  ;;  %p1596_p7 = scmp.lt.s32.totalorder %s2601_s10, 15  ;;  %v1218_v15 = vpop.f32.mrf.mxu2 }
  0xcd   :  { %274 = vst.msk [vmem:[#allocation2 + $0x32] sm:$0x1] %vm72_vm0, %v273_v63  ;;  %s415_s16 = scalar_select %p414_p6, %s2601_s10, 0 }
  0xce   :  { %s345_s17 = scalar_lea.vmem [#allocation5], %s2815_s9  ;;  %p487_p8 = scmp.gt.s32.totalorder %s2603_s11, 0 }
  0xcf   :  { %v346_v0 = vld [vmem:[%s345_s17] sm:$0x1]  ;;  %p1644_p9 = scmp.lt.s32.totalorder %s2603_s11, 15  ;;  %s2817_s16 = smov (!%p1596_p7, %s415_s16), 15 }
  0xd0   :  { %347 = vst.msk [vmem:[#allocation2 + $0x33] sm:$0x1] %vm72_vm0, %v346_v0  ;;  %s2819_s11 = smov (!%p487_p8, %s2603_s11), 0  ;;  %s1691_s18 = sld [smem:[#allocation4 + $0x36]] }
  0xd1   :  { %s418_s19 = scalar_lea.vmem [#allocation5], %s2817_s16  ;;  %s2821_s11 = smov (!%p1644_p9, %s2819_s11), 15 }
  0xd2   :  { %v419_v1 = vld [vmem:[%s418_s19] sm:$0x1]  ;;  %s1739_s20 = sld [smem:[#allocation4 + $0x3e]]  ;;  %s491_s22 = scalar_lea.vmem [#allocation5], %s2821_s11 }
  0xd3   :  { %420 = vst.msk [vmem:[#allocation2 + $0x34] sm:$0x1] %vm72_vm0, %v419_v1  ;;  %s1409_s21 = sld [smem:[#allocation4 + $0x7]]  ;;  %v492_v2 = vld [vmem:[%s491_s22] sm:$0x1]  ;;  %s1291_s16 = sshll.u32 %s2309_s3, 4  ;;  %s1292_s16 = int_to_ptr.vmem [resolvable:$true] %s1291_s16 }
  0xd4   :  { %s1457_s23 = sld [smem:[#allocation4 + $0xf]]  ;;  %493 = vst.msk [vmem:[#allocation2 + $0x35] sm:$0x1] %vm72_vm0, %v492_v2  ;;  %s1293_s19 = sshll.u32 %s2653_s4, 4  ;;  %s1294_s19 = int_to_ptr.hbm [resolvable:$true] %s1293_s19 }
  0xd5   :  { %s2623_s24 = sld [smem:[#allocation4 + $0x17]] }
  0xd6   :  { %p560_p10 = scmp.gt.s32.totalorder %s1691_s18, 0  ;;  %p1692_p11 = scmp.lt.s32.totalorder %s1691_s18, 15 }
  0xd7   :  { %s2625_s25 = sld [smem:[#allocation4 + $0x1f]] }
  0xd8   :  { %s2823_s18 = smov (!%p560_p10, %s1691_s18), 0  ;;  %p633_p12 = scmp.gt.s32.totalorder %s1739_s20, 0 }
  0xd9   :  { %p1740_p13 = scmp.lt.s32.totalorder %s1739_s20, 15  ;;  %s2825_s18 = smov (!%p1692_p11, %s2823_s18), 15 }
  0xda   :  { %s2827_s20 = smov (!%p633_p12, %s1739_s20), 0  ;;  %p130_p0 = scmp.gt.s32.totalorder %s1409_s21, 0 }
  0xdb   :  { %s564_s0 = scalar_lea.vmem [#allocation5], %s2825_s18  ;;  %s2829_s20 = smov (!%p1740_p13, %s2827_s20), 15 }
  0xdc   :  { %v565_v3 = vld [vmem:[%s564_s0] sm:$0x1]  ;;  %s131_s26 = scalar_select %p130_p0, %s1409_s21, 0 }
  0xdd   :  { %566 = vst.msk [vmem:[#allocation2 + $0x36] sm:$0x1] %vm72_vm0, %v565_v3  ;;  %p1410_p1 = scmp.lt.s32.totalorder %s1409_s21, 15  ;;  %s637_s27 = scalar_lea.vmem [#allocation5], %s2829_s20 }
  0xde   :  { %v638_v4 = vld [vmem:[%s637_s27] sm:$0x1]  ;;  %p204_p2 = scmp.gt.s32.totalorder %s1457_s23, 0  ;;  %p1458_p3 = scmp.lt.s32.totalorder %s1457_s23, 15 }
  0xdf   :  { %639 = vst.msk [vmem:[#allocation2 + $0x37] sm:$0x1] %vm72_vm0, %v638_v4  ;;  %s2831_s26 = smov (!%p1410_p1, %s131_s26), 15  ;;  %p277_p4 = scmp.gt.s32.totalorder %s2623_s24, 0  ;;  %v1229_v12 = vpop.f32.mrf.mxu3 }
  0xe0   :  { %s2833_s23 = smov (!%p204_p2, %s1457_s23), 0  ;;  %s134_s28 = scalar_lea.vmem [#allocation5], %s2831_s26 }
  0xe1   :  { %v135_v5 = vld [vmem:[%s134_s28] sm:$0x1]  ;;  %s2835_s23 = smov (!%p1458_p3, %s2833_s23), 15  ;;  %p1506_p5 = scmp.lt.s32.totalorder %s2623_s24, 15 }
  0xe2   :  { %136 = vst.msk [vmem:[#allocation2 + $0x38] sm:$0x1] %vm72_vm0, %v135_v5  ;;  %s278_s29 = scalar_select %p277_p4, %s2623_s24, 0 }
  0xe3   :  { %s208_s30 = scalar_lea.vmem [#allocation5], %s2835_s23  ;;  %p350_p6 = scmp.gt.s32.totalorder %s2625_s25, 0 }
  0xe4   :  { %v209_v6 = vld [vmem:[%s208_s30] sm:$0x1]  ;;  %p1554_p7 = scmp.lt.s32.totalorder %s2625_s25, 15  ;;  %s2837_s29 = smov (!%p1506_p5, %s278_s29), 15 }
  0xe5   :  { %210 = vst.msk [vmem:[#allocation2 + $0x39] sm:$0x1] %vm72_vm0, %v209_v6  ;;  %s2839_s25 = smov (!%p350_p6, %s2625_s25), 0  ;;  %s1601_s5 = sld [smem:[#allocation4 + $0x27]] }
  0xe6   :  { %v655_v7 = vld [vmem:[#allocation2 + $0x30] sm:$0xff]  ;;  %s281_s1 = scalar_lea.vmem [#allocation5], %s2837_s29  ;;  %s2841_s25 = smov (!%p1554_p7, %s2839_s25), 15 }
  0xe7   :  { %v663_v8 = vpack.c.bf16 %v655_v7, %v655_v7  ;;  %v282_v9 = vld [vmem:[%s281_s1] sm:$0x1]  ;;  %s1649_s6 = sld [smem:[#allocation4 + $0x2f]]  ;;  %s354_s2 = scalar_lea.vmem [#allocation5], %s2841_s25  ;;  %v1231_v16 = vpop.f32.mrf.mxu3 }
  0xe8   :  { %283 = vst.msk [vmem:[#allocation2 + $0x3a] sm:$0x1] %vm72_vm0, %v282_v9  ;;  %v355_v13 = vld [vmem:[%s354_s2] sm:$0x1]  ;;  %s1697_s7 = sld [smem:[#allocation4 + $0x37]] }
  0xe9   :  { %1267 = vmatmul.bf16.vlgmr.msrb.gmra.mxu2 %v663_v8  ;;  %356 = vst.msk [vmem:[#allocation2 + $0x3b] sm:$0x1] %vm72_vm0, %v355_v13  ;;  %s1745_s8 = sld [smem:[#allocation4 + $0x3f]] }
  0xeb   :  { %p423_p8 = scmp.gt.s32.totalorder %s1601_s5, 0  ;;  %p1602_p9 = scmp.lt.s32.totalorder %s1601_s5, 15 }
  0xed   :  { %s2843_s5 = smov (!%p423_p8, %s1601_s5), 0  ;;  %p496_p10 = scmp.gt.s32.totalorder %s1649_s6, 0 }
  0xee   :  { %p1650_p11 = scmp.lt.s32.totalorder %s1649_s6, 15  ;;  %s2845_s5 = smov (!%p1602_p9, %s2843_s5), 15 }
  0xef   :  { %s2847_s6 = smov (!%p496_p10, %s1649_s6), 0  ;;  %p569_p12 = scmp.gt.s32.totalorder %s1697_s7, 0 }
  0xf0   :  { %s427_s9 = scalar_lea.vmem [#allocation5], %s2845_s5  ;;  %s2849_s6 = smov (!%p1650_p11, %s2847_s6), 15 }
  0xf1   :  { %v428_v17 = vld [vmem:[%s427_s9] sm:$0x1]  ;;  %s570_s10 = scalar_select %p569_p12, %s1697_s7, 0 }
  0xf2   :  { %v1190_v10 = vpop.f32.mrf.mxu0  ;;  %429 = vst.msk [vmem:[#allocation2 + $0x3c] sm:$0x1] %vm72_vm0, %v428_v17  ;;  %p1698_p13 = scmp.lt.s32.totalorder %s1697_s7, 15  ;;  %s500_s13 = scalar_lea.vmem [#allocation5], %s2849_s6 }
  0xf3   :  { %v501_v19 = vld [vmem:[%s500_s13] sm:$0x1]  ;;  %p642_p0 = scmp.gt.s32.totalorder %s1745_s8, 0  ;;  %p1746_p1 = scmp.lt.s32.totalorder %s1745_s8, 15  ;;  %v1191_v20 = vadd.f32 %v2208_v18, %v1190_v10 }
  0xf4   :  { %502 = vst.msk [vmem:[#allocation2 + $0x3d] sm:$0x1] %vm72_vm0, %v501_v19  ;;  %s2851_s10 = smov (!%p1698_p13, %s570_s10), 15 }
  0xf5   :  { %s2853_s8 = smov (!%p642_p0, %s1745_s8), 0  ;;  %s573_s14 = scalar_lea.vmem [#allocation5], %s2851_s10 }
  0xf6   :  { %v574_v21 = vld [vmem:[%s573_s14] sm:$0x1]  ;;  %s2855_s8 = smov (!%p1746_p1, %s2853_s8), 15 }
  0xf7   :  { %575 = vst.msk [vmem:[#allocation2 + $0x3e] sm:$0x1] %vm72_vm0, %v574_v21  ;;  %s646_s15 = scalar_lea.vmem [#allocation5], %s2855_s8 }
  0xf8   :  { %v647_v23 = vld [vmem:[%s646_s15] sm:$0x1] }
  0xf9   :  { %648 = vst.msk [vmem:[#allocation2 + $0x3f] sm:$0x1] %vm72_vm0, %v647_v23 }
  0xfa   :  { %v1192_v14 = vpop.f32.mrf.mxu0 }
 0x100   :  { %v656_v28 = vld [vmem:[#allocation2 + $0x38] sm:$0xff] }
 0x101   :  { %v664_v29 = vpack.c.bf16 %v656_v28, %v656_v28 }
 0x103   :  { %1280 = vmatmul.bf16.vlgmr.msrb.gmra.mxu3 %v664_v29 }
 0x112   :  { %v1203_v22 = vpop.f32.mrf.mxu1 }
 0x113   :  { %v1204_v24 = vadd.f32 %v1203_v22, %v1191_v20 }
 0x115   :  { %v1217_v25 = vadd.f32 %v1216_v11, %v1204_v24 }
 0x117   :  { %v1230_v26 = vadd.f32 %v1229_v12, %v1217_v25 }
 0x11a   :  { %v1205_v27 = vpop.f32.mrf.mxu1 }
 0x12d   :  { %v1242_v30 = vpop.f32.mrf.mxu0 }
 0x12e   :  { %v1243_v31 = vadd.f32 %v1242_v30, %v1230_v26 }
 0x135   :  { %v1244_v32 = vpop.f32.mrf.mxu0 }
 0x146   :  { %v1255_v33 = vpop.f32.mrf.mxu1 }
 0x147   :  { %v1256_v34 = vadd.f32 %v1255_v33, %v1243_v31 }
 0x14e   :  { %v1257_v35 = vpop.f32.mrf.mxu1 }
 0x16c   :  { %v1268_v36 = vpop.f32.mrf.mxu2 }
 0x16d   :  { %v1269_v38 = vadd.f32 %v1268_v36, %v1256_v34 }
 0x174   :  { %v1270_v37 = vpop.f32.mrf.mxu2 }
 0x186   :  { %v1281_v39 = vpop.f32.mrf.mxu3 }
 0x187   :  { %v1282_v40 = vadd.f32 %v1281_v39, %v1269_v38 }
 0x189   :  { %1285 = vst [vmem:[#allocation10] sm:$0xff] %v1282_v40 }
 0x18a   :  { %1296 = dma.vmem_to_hbm [thread:$0]  %s1292_s16, 128, %s1294_s19, [#allocation7]  }
 0x18e   :  { %v1283_v41 = vpop.f32.mrf.mxu3 }
 0x18f   :  { %2299 = dma.done.wait [#allocation7], 128  }
 0x190   :  { %2300 = vsyncadd [#allocation7], 4294967168 }
 0x191   :  { %1301 = vsyncpa [#allocation6], 1 }
 0x192   :  { %1302 = vsyncpa [#allocation9], 1 }
 0x193   :  { %1303 = vsyncpa [#allocation7], 1 }

</bundles_post_ra>
